<compile_context>
chip_gen: v7x
topology: tpu7x:2x2x1
jax: 0.10.0
libtpu: 0.0.40
codegen_flags: <defaults>
</compile_context>

<pallas_src>
import math
import functools

import jax
import jax.numpy as jnp
from jax import lax
from jax.experimental import pallas as pl
from jax.experimental.pallas import tpu as pltpu


COMPUTE_DTYPE = jnp.bfloat16   # MXU input dtype; accumulation is always f32.


# ----------------------------- in-kernel helpers -----------------------------

def _layer_norm(x, gamma, beta, eps=1e-12):
    # Two-pass variance (numerically robust, matches nn.LayerNorm behaviour).
    m = jnp.mean(x, axis=-1, keepdims=True)
    d = x - m
    var = jnp.mean(d * d, axis=-1, keepdims=True)
    return d * lax.rsqrt(var + eps) * gamma + beta


def _gelu_exact(x):
    # nn.GELU() default = exact erf-based GELU.
    return 0.5 * x * (1.0 + lax.erf(x * 0.7071067811865476))


# --------------------------------- kernel ------------------------------------

def transformer_block_kernel(mask_ref, h_ref,
                             wqkv_ref, bqkv_ref,
                             wd_ref, bd_ref, g1_ref, be1_ref,
                             wi_ref, bi_ref, wo_ref, bo_ref, g2_ref, be2_ref,
                             out_ref,
                             k_scr, v_scr,
                             *, num_heads, head_dim, tq):
    """One TransformerBlock forward for one (batch, query-tile) grid cell.

    h_ref:    (1, S, H) full-sequence hidden_states (resident across qi)
    mask_ref: (1, 1, 1, S) additive attention mask
    k_scr/v_scr: (nh, S, hd) bf16 VMEM scratch, written once per batch elem
    out_ref:  (1, TQ, H)
    """
    H = num_heads * head_dim
    S = h_ref.shape[1]
    qi = pl.program_id(1)

    # ---- K/V projection hoisted out of the query-tile axis (once per b) ----
    @pl.when(qi == 0)
    def _():
        xf_bf = h_ref[0].astype(COMPUTE_DTYPE)                       # (S, H)
        kv = jnp.dot(xf_bf, wqkv_ref[:, H:],
                     preferred_element_type=jnp.float32) + bqkv_ref[:, H:]
        k = kv[:, :H].reshape(S, num_heads, head_dim)
        v = kv[:, H:].reshape(S, num_heads, head_dim)
        k_scr[...] = jnp.transpose(k, (1, 0, 2)).astype(COMPUTE_DTYPE)
        v_scr[...] = jnp.transpose(v, (1, 0, 2)).astype(COMPUTE_DTYPE)

    # ---- query tile, sliced from the already-resident full-seq block ----
    q_start = pl.multiple_of(qi * tq, tq)
    x_q = h_ref[0, pl.ds(q_start, tq), :]                 # (TQ, H) f32 residual
    mask = mask_ref[0]                                    # (1, 1, S)

    q = jnp.dot(x_q.astype(COMPUTE_DTYPE), wqkv_ref[:, :H],
                preferred_element_type=jnp.float32) + bqkv_ref[:, :H]
    # Fold the attention scale into q once (cheaper than scaling every score).
    q = q * (1.0 / math.sqrt(head_dim))
    q = jnp.transpose(q.reshape(tq, num_heads, head_dim),
                      (1, 0, 2)).astype(COMPUTE_DTYPE)    # (nh, TQ, hd)

    # ---- head-batched attention (bf16 MXU, f32 accumulation) ----
    s = jnp.einsum('hqd,hkd->hqk', q, k_scr[...],
                   preferred_element_type=jnp.float32)    # (nh, TQ, S)
    s = s + mask                                          # broadcast over h, q
    p = jnp.exp(s - jnp.max(s, axis=-1, keepdims=True))   # fused sub+exp pass
    denom = jnp.sum(p, axis=-1, keepdims=True)
    p = p * pl.reciprocal(denom, approx=True)             # softmax (EUP recip)
    ctx = jnp.einsum('hqk,hkd->hqd', p.astype(COMPUTE_DTYPE), v_scr[...],
                     preferred_element_type=jnp.float32)  # (nh, TQ, hd)
    ctx = jnp.transpose(ctx, (1, 0, 2)).reshape(tq, H)    # lane-dense (TQ, H)

    # ---- attention output projection + residual + LayerNorm ----
    attn = jnp.dot(ctx.astype(COMPUTE_DTYPE), wd_ref[...],
                   preferred_element_type=jnp.float32) + bd_ref[...]
    attn = _layer_norm(attn + x_q, g1_ref[...], be1_ref[...])

    # ---- feed-forward (GELU + residual + LayerNorm, fused epilogue) ----
    inter = jnp.dot(attn.astype(COMPUTE_DTYPE), wi_ref[...],
                    preferred_element_type=jnp.float32) + bi_ref[...]
    inter = _gelu_exact(inter)
    ffn = jnp.dot(inter.astype(COMPUTE_DTYPE), wo_ref[...],
                  preferred_element_type=jnp.float32) + bo_ref[...]
    out = _layer_norm(ffn + attn, g2_ref[...], be2_ref[...])

    out_ref[0] = out.astype(out_ref.dtype)


# ------------------------------ python wrapper --------------------------------

def _largest_tile(n, cap):
    """Largest tile <= cap that divides n (avoids ragged/OOB query tiles)."""
    t = min(n, cap)
    while n % t:
        t -= 1
    return t


def _vmem_limit_bytes():
    # Generation-aware VMEM budget: ~62% of physical VMEM, capped at 96 MiB.
    # v7x (64 MiB phys) -> ~40 MiB; v5e/v6e (128 MiB) -> ~80 MiB.
    try:
        cap = pltpu.get_tpu_info().vmem_capacity_bytes
        return min((cap * 5) // 8, 96 * 1024 * 1024)
    except Exception:
        return 48 * 1024 * 1024


def transformer_block(hidden, mask, packed, *, num_heads, tq=None):
    B, S, H = hidden.shape
    head_dim = H // num_heads
    I = packed["wi"].shape[1]

    if tq is None:
        tq = _largest_tile(S, 256)      # query-tile size; must divide S
    assert S % tq == 0, "tq must divide S"
    n_q = S // tq

    weight_order = ("wqkv", "bqkv", "wd", "bd", "g1", "be1",
                    "wi", "bi", "wo", "bo", "g2", "be2")
    weights = [packed[n] for n in weight_order]

    def wspec(w):
        nd = w.ndim
        # Constant index map -> single-buffer (halves resident weight VMEM).
        return pl.BlockSpec(w.shape, lambda b, qi, _nd=nd: (0,) * _nd,
                            pipeline_mode=pl.Buffered(1))

    kernel = functools.partial(transformer_block_kernel,
                               num_heads=num_heads, head_dim=head_dim, tq=tq)

    # Advisory cost estimate for XLA scheduling of the per-layer custom calls.
    flops = 2 * B * S * H * (4 * H + 2 * I) + 4 * B * S * S * H
    transcendentals = B * num_heads * S * S + B * S * I
    weight_bytes = 2 * (4 * H * H + 2 * H * I) + 4 * (9 * H + I)
    bytes_accessed = 2 * B * S * H * 4 + B * S * 4 + weight_bytes

    return pl.pallas_call(
        kernel,
        out_shape=jax.ShapeDtypeStruct((B, S, H), jnp.float32),
        grid_spec=pltpu.PrefetchScalarGridSpec(
            num_scalar_prefetch=0,
            grid=(B, n_q),
            in_specs=[
                pl.BlockSpec((1, 1, 1, S), lambda b, qi: (b, 0, 0, 0)),  # mask
                pl.BlockSpec((1, S, H), lambda b, qi: (b, 0, 0)),        # hidden (full S)
            ] + [wspec(w) for w in weights],
            out_specs=pl.BlockSpec((1, tq, H), lambda b, qi: (b, qi, 0)),
            scratch_shapes=[
                pltpu.VMEM((num_heads, S, head_dim), COMPUTE_DTYPE),     # K cache
                pltpu.VMEM((num_heads, S, head_dim), COMPUTE_DTYPE),     # V cache
            ],
        ),
        compiler_params=pltpu.CompilerParams(
            # qi must be "arbitrary": K/V scratch is carried across query tiles.
            dimension_semantics=("parallel", "arbitrary"),
            vmem_limit_bytes=_vmem_limit_bytes(),
        ),
        cost_estimate=pl.CostEstimate(flops=flops,
                                      transcendentals=transcendentals,
                                      bytes_accessed=bytes_accessed),
    )(mask, hidden, *weights)


def pack_layer_params(p, compute_dtype=COMPUTE_DTYPE):
    """Fuse Q|K|V weights/biases and cast matmul weights to bf16 (done once)."""
    return {
        "wqkv": jnp.concatenate([p["wq"], p["wk"], p["wv"]], axis=1).astype(compute_dtype),
        "bqkv": jnp.concatenate([p["bq"], p["bk"], p["bv"]], axis=1),
        "wd": p["wd"].astype(compute_dtype), "bd": p["bd"],
        "g1": p["g1"], "be1": p["be1"],
        "wi": p["wi"].astype(compute_dtype), "bi": p["bi"],
        "wo": p["wo"].astype(compute_dtype), "bo": p["bo"],
        "g2": p["g2"], "be2": p["be2"],
    }


def bert_encoder(hidden, mask, packed_layers, *, num_heads):
    """Returns list of per-layer outputs, like BertEncoder.forward.

    `packed_layers` must already be packed (pack_layer_params), so no weight
    repacking happens on the per-forward path.
    """
    all_layers = []
    for packed in packed_layers:
        hidden = transformer_block(hidden, mask, packed, num_heads=num_heads)
        all_layers.append(hidden)
    return all_layers


# ------------------------------ parameter init --------------------------------

def init_layer_params(key, hidden_size, intermediate_size):
    ks = jax.random.split(key, 6)
    std = 0.02
    H, I = hidden_size, intermediate_size
    return {
        # Linear layers stored as (in, out); forward is x @ W + b
        "wq": jax.random.normal(ks[0], (H, H), jnp.float32) * std,
        "bq": jnp.zeros((1, H), jnp.float32),
        "wk": jax.random.normal(ks[1], (H, H), jnp.float32) * std,
        "bk": jnp.zeros((1, H), jnp.float32),
        "wv": jax.random.normal(ks[2], (H, H), jnp.float32) * std,
        "bv": jnp.zeros((1, H), jnp.float32),
        "wd": jax.random.normal(ks[3], (H, H), jnp.float32) * std,
        "bd": jnp.zeros((1, H), jnp.float32),
        "g1": jnp.ones((1, H), jnp.float32),
        "be1": jnp.zeros((1, H), jnp.float32),
        "wi": jax.random.normal(ks[4], (H, I), jnp.float32) * std,
        "bi": jnp.zeros((1, I), jnp.float32),
        "wo": jax.random.normal(ks[5], (I, H), jnp.float32) * std,
        "bo": jnp.zeros((1, H), jnp.float32),
        "g2": jnp.ones((1, H), jnp.float32),
        "be2": jnp.zeros((1, H), jnp.float32),
    }


# ----------------------------------- main --------------------------------------

if __name__ == "__main__":
    # Small BERT-style config
    B, S, H = 2, 8, 32
    NUM_HEADS = 4
    INTERMEDIATE = 64
    NUM_LAYERS = 2

    key = jax.random.PRNGKey(0)
    k_in, k_params = jax.random.split(key)

    hidden = jax.random.normal(k_in, (B, S, H), jnp.float32)

    # Additive attention mask: mask out the last 2 tokens of batch element 1.
    valid = jnp.array([[1] * S, [1] * (S - 2) + [0] * 2], dtype=jnp.float32)
    mask = (1.0 - valid)[:, None, None, :] * (-10000.0)        # (B,1,1,S)

    layer_keys = jax.random.split(k_params, NUM_LAYERS)
    layer_params = [init_layer_params(k, H, INTERMEDIATE) for k in layer_keys]

    # Weight packing hoisted out of the per-forward path (done once).
    packed_layers = [pack_layer_params(p) for p in layer_params]

    outs = bert_encoder(hidden, mask, packed_layers, num_heads=NUM_HEADS)
    for o in outs:
        jax.block_until_ready(o)

    assert len(outs) == NUM_LAYERS
    assert all(o.shape == (B, S, H) for o in outs)
    print("KERNEL_OK")
</pallas_src>

<mosaic_0001>
module attributes {stable_mosaic.version = 11 : i64} {
  func.func @transformer_block_kernel(%arg0: i32, %arg1: i32, %arg2: memref<1x1x1x8xf32, #tpu.memory_space<vmem>>, %arg3: memref<1x8x32xf32, #tpu.memory_space<vmem>>, %arg4: memref<32x96xbf16, #tpu.memory_space<vmem>>, %arg5: memref<1x96xf32, #tpu.memory_space<vmem>>, %arg6: memref<32x32xbf16, #tpu.memory_space<vmem>>, %arg7: memref<1x32xf32, #tpu.memory_space<vmem>>, %arg8: memref<1x32xf32, #tpu.memory_space<vmem>>, %arg9: memref<1x32xf32, #tpu.memory_space<vmem>>, %arg10: memref<32x64xbf16, #tpu.memory_space<vmem>>, %arg11: memref<1x64xf32, #tpu.memory_space<vmem>>, %arg12: memref<64x32xbf16, #tpu.memory_space<vmem>>, %arg13: memref<1x32xf32, #tpu.memory_space<vmem>>, %arg14: memref<1x32xf32, #tpu.memory_space<vmem>>, %arg15: memref<1x32xf32, #tpu.memory_space<vmem>>, %arg16: memref<1x8x32xf32, #tpu.memory_space<vmem>>, %arg17: memref<4x8x8xbf16, #tpu.memory_space<vmem>>, %arg18: memref<4x8x8xbf16, #tpu.memory_space<vmem>>) attributes {dimension_semantics = [#tpu.dimension_semantics<parallel>, #tpu.dimension_semantics<arbitrary>], iteration_bounds = array<i64: 2, 1>, scalar_prefetch = 0 : i64, scratch_operands = 2 : i64, tpu.core_type = #tpu.core_type<tc>, window_params = [{transform_indices = @transform_0, window_bounds = array<i64: 1, 1, 1, 8>}, {transform_indices = @transform_1, window_bounds = array<i64: 1, 8, 32>}, {pipeline_mode = #tpu.pipeline_mode<synchronous>, transform_indices = @transform_2, window_bounds = array<i64: 32, 96>}, {pipeline_mode = #tpu.pipeline_mode<synchronous>, transform_indices = @transform_3, window_bounds = array<i64: 1, 96>}, {pipeline_mode = #tpu.pipeline_mode<synchronous>, transform_indices = @transform_4, window_bounds = array<i64: 32, 32>}, {pipeline_mode = #tpu.pipeline_mode<synchronous>, transform_indices = @transform_5, window_bounds = array<i64: 1, 32>}, {pipeline_mode = #tpu.pipeline_mode<synchronous>, transform_indices = @transform_6, window_bounds = array<i64: 1, 32>}, {pipeline_mode = #tpu.pipeline_mode<synchronous>, transform_indices = @transform_7, window_bounds = array<i64: 1, 32>}, {pipeline_mode = #tpu.pipeline_mode<synchronous>, transform_indices = @transform_8, window_bounds = array<i64: 32, 64>}, {pipeline_mode = #tpu.pipeline_mode<synchronous>, transform_indices = @transform_9, window_bounds = array<i64: 1, 64>}, {pipeline_mode = #tpu.pipeline_mode<synchronous>, transform_indices = @transform_10, window_bounds = array<i64: 64, 32>}, {pipeline_mode = #tpu.pipeline_mode<synchronous>, transform_indices = @transform_11, window_bounds = array<i64: 1, 32>}, {pipeline_mode = #tpu.pipeline_mode<synchronous>, transform_indices = @transform_12, window_bounds = array<i64: 1, 32>}, {pipeline_mode = #tpu.pipeline_mode<synchronous>, transform_indices = @transform_13, window_bounds = array<i64: 1, 32>}, {transform_indices = @transform_14, window_bounds = array<i64: 1, 8, 32>}]} {
    %c0_i32 = arith.constant 0 : i32
    %0 = arith.cmpi eq, %arg1, %c0_i32 : i32
    %1 = arith.extui %0 : i1 to i32
    %c0_i32_0 = arith.constant 0 : i32
    %2 = arith.cmpi ne, %1, %c0_i32_0 : i32
    scf.if %2 {
      %c0_60 = arith.constant 0 : index
      %c0_61 = arith.constant 0 : index
      %c0_62 = arith.constant 0 : index
      %115 = vector.load %arg3[%c0_60, %c0_61, %c0_62] : memref<1x8x32xf32, #tpu.memory_space<vmem>>, vector<1x8x32xf32>
      %116 = vector.shape_cast %115 : vector<1x8x32xf32> to vector<8x32xf32>
      %117 = arith.truncf %116 : vector<8x32xf32> to vector<8x32xbf16>
      %c0_63 = arith.constant 0 : index
      %c32 = arith.constant 32 : index
      %118 = vector.load %arg4[%c0_63, %c32] : memref<32x96xbf16, #tpu.memory_space<vmem>>, vector<32x64xbf16>
      %cst_64 = arith.constant dense<0.000000e+00> : vector<8x64xf32>
      %119 = tpu.matmul %117, %118, %cst_64 {dimension_numbers = #tpu.dot_dimension_numbers<[1], [0], [0], [1], [0, 0, 1, 1], [], []>} : vector<8x32xbf16>, vector<32x64xbf16>, vector<8x64xf32> -> vector<8x64xf32>
      %c0_65 = arith.constant 0 : index
      %c32_66 = arith.constant 32 : index
      %120 = vector.load %arg5[%c0_65, %c32_66] : memref<1x96xf32, #tpu.memory_space<vmem>>, vector<1x64xf32>
      %121 = vector.broadcast %120 : vector<1x64xf32> to vector<8x64xf32>
      %122 = arith.addf %119, %121 : vector<8x64xf32>
      %123 = vector.extract_strided_slice %122 {offsets = [0, 0], sizes = [8, 32], strides = [1, 1]} : vector<8x64xf32> to vector<8x32xf32>
      %124 = vector.shape_cast %123 : vector<8x32xf32> to vector<8x4x8xf32>
      %125 = vector.extract_strided_slice %122 {offsets = [0, 32], sizes = [8, 32], strides = [1, 1]} : vector<8x64xf32> to vector<8x32xf32>
      %126 = vector.shape_cast %125 : vector<8x32xf32> to vector<8x4x8xf32>
      %127 = tpu.transpose %124, [1, 0, 2] : vector<8x4x8xf32> -> vector<4x8x8xf32>
      %128 = arith.truncf %127 : vector<4x8x8xf32> to vector<4x8x8xbf16>
      %c0_67 = arith.constant 0 : index
      %c0_68 = arith.constant 0 : index
      %c0_69 = arith.constant 0 : index
      %129 = vector.load %arg17[%c0_67, %c0_68, %c0_69] : memref<4x8x8xbf16, #tpu.memory_space<vmem>>, vector<4x8x8xbf16>
      tpu.vector_store %arg17[%c0_67, %c0_68, %c0_69], %128 {strides = array<i32>} : memref<4x8x8xbf16, #tpu.memory_space<vmem>>, vector<4x8x8xbf16>,
      %130 = tpu.transpose %126, [1, 0, 2] : vector<8x4x8xf32> -> vector<4x8x8xf32>
      %131 = arith.truncf %130 : vector<4x8x8xf32> to vector<4x8x8xbf16>
      %c0_70 = arith.constant 0 : index
      %c0_71 = arith.constant 0 : index
      %c0_72 = arith.constant 0 : index
      %132 = vector.load %arg18[%c0_70, %c0_71, %c0_72] : memref<4x8x8xbf16, #tpu.memory_space<vmem>>, vector<4x8x8xbf16>
      tpu.vector_store %arg18[%c0_70, %c0_71, %c0_72], %131 {strides = array<i32>} : memref<4x8x8xbf16, #tpu.memory_space<vmem>>, vector<4x8x8xbf16>,
    } else {
    }
    %c8_i32 = arith.constant 8 : i32
    %3 = arith.muli %arg1, %c8_i32 : i32
    %4 = tpu.assume_multiple %3, 8 : i32
    %c0 = arith.constant 0 : index
    %5 = arith.index_cast %4 : i32 to index
    %c0_1 = arith.constant 0 : index
    %6 = vector.load %arg3[%c0, %5, %c0_1] : memref<1x8x32xf32, #tpu.memory_space<vmem>>, vector<1x8x32xf32>
    %7 = vector.shape_cast %6 : vector<1x8x32xf32> to vector<8x32xf32>
    %c0_2 = arith.constant 0 : index
    %c0_3 = arith.constant 0 : index
    %c0_4 = arith.constant 0 : index
    %c0_5 = arith.constant 0 : index
    %8 = vector.load %arg2[%c0_2, %c0_3, %c0_4, %c0_5] : memref<1x1x1x8xf32, #tpu.memory_space<vmem>>, vector<1x1x1x8xf32>
    %9 = vector.shape_cast %8 : vector<1x1x1x8xf32> to vector<1x1x8xf32>
    %10 = arith.truncf %7 : vector<8x32xf32> to vector<8x32xbf16>
    %c0_6 = arith.constant 0 : index
    %c0_7 = arith.constant 0 : index
    %11 = vector.load %arg4[%c0_6, %c0_7] : memref<32x96xbf16, #tpu.memory_space<vmem>>, vector<32x32xbf16>
    %cst = arith.constant dense<0.000000e+00> : vector<8x32xf32>
    %12 = tpu.matmul %10, %11, %cst {dimension_numbers = #tpu.dot_dimension_numbers<[1], [0], [0], [1], [0, 0, 1, 1], [], []>} : vector<8x32xbf16>, vector<32x32xbf16>, vector<8x32xf32> -> vector<8x32xf32>
    %c0_8 = arith.constant 0 : index
    %c0_9 = arith.constant 0 : index
    %13 = vector.load %arg5[%c0_8, %c0_9] : memref<1x96xf32, #tpu.memory_space<vmem>>, vector<1x32xf32>
    %14 = vector.broadcast %13 : vector<1x32xf32> to vector<8x32xf32>
    %15 = arith.addf %12, %14 : vector<8x32xf32>
    %cst_10 = arith.constant 0.353553385 : f32
    %16 = vector.broadcast %cst_10 : f32 to vector<8x32xf32>
    %17 = arith.mulf %15, %16 : vector<8x32xf32>
    %18 = vector.shape_cast %17 : vector<8x32xf32> to vector<8x4x8xf32>
    %19 = tpu.transpose %18, [1, 0, 2] : vector<8x4x8xf32> -> vector<4x8x8xf32>
    %20 = arith.truncf %19 : vector<4x8x8xf32> to vector<4x8x8xbf16>
    %c0_11 = arith.constant 0 : index
    %c0_12 = arith.constant 0 : index
    %c0_13 = arith.constant 0 : index
    %21 = vector.load %arg17[%c0_11, %c0_12, %c0_13] : memref<4x8x8xbf16, #tpu.memory_space<vmem>>, vector<4x8x8xbf16>
    "tpu.trace_start"() <{level = 10 : i32, message = "hqd,hkd->hqk"}> : () -> ()
    %cst_14 = arith.constant dense<0.000000e+00> : vector<4x8x8xf32>
    %22 = tpu.matmul %20, %21, %cst_14 {dimension_numbers = #tpu.dot_dimension_numbers<[2], [2], [1], [1], [0, 0, 0, 1, 1, 1], [0], [0]>} : vector<4x8x8xbf16>, vector<4x8x8xbf16>, vector<4x8x8xf32> -> vector<4x8x8xf32>
    "tpu.trace_stop"() : () -> ()
    %23 = vector.broadcast %9 : vector<1x1x8xf32> to vector<4x8x8xf32>
    %24 = arith.addf %22, %23 : vector<4x8x8xf32>
    %cst_15 = arith.constant dense<0xFF800000> : vector<4x8xf32>
    %25 = vector.multi_reduction <maximumf>, %24, %cst_15 [2] : vector<4x8x8xf32> to vector<4x8xf32>
    %26 = vector.shape_cast %25 : vector<4x8xf32> to vector<4x8x1xf32>
    %27 = vector.broadcast %26 : vector<4x8x1xf32> to vector<4x8x8xf32>
    %28 = arith.subf %24, %27 : vector<4x8x8xf32>
    %29 = math.exp %28 : vector<4x8x8xf32>
    %cst_16 = arith.constant dense<0.000000e+00> : vector<4x8xf32>
    %30 = vector.multi_reduction <add>, %29, %cst_16 [2] : vector<4x8x8xf32> to vector<4x8xf32>
    %31 = vector.shape_cast %30 : vector<4x8xf32> to vector<4x8x1xf32>
    %32 = tpu.reciprocal %31 {approx = true} : vector<4x8x1xf32> -> vector<4x8x1xf32>
    %33 = vector.broadcast %32 : vector<4x8x1xf32> to vector<4x8x8xf32>
    %34 = arith.mulf %29, %33 : vector<4x8x8xf32>
    %35 = arith.truncf %34 : vector<4x8x8xf32> to vector<4x8x8xbf16>
    %c0_17 = arith.constant 0 : index
    %c0_18 = arith.constant 0 : index
    %c0_19 = arith.constant 0 : index
    %36 = vector.load %arg18[%c0_17, %c0_18, %c0_19] : memref<4x8x8xbf16, #tpu.memory_space<vmem>>, vector<4x8x8xbf16>
    "tpu.trace_start"() <{level = 10 : i32, message = "hqk,hkd->hqd"}> : () -> ()
    %cst_20 = arith.constant dense<0.000000e+00> : vector<4x8x8xf32>
    %37 = tpu.matmul %35, %36, %cst_20 {dimension_numbers = #tpu.dot_dimension_numbers<[2], [1], [1], [2], [0, 0, 0, 1, 1, 2], [0], [0]>} : vector<4x8x8xbf16>, vector<4x8x8xbf16>, vector<4x8x8xf32> -> vector<4x8x8xf32>
    "tpu.trace_stop"() : () -> ()
    %38 = tpu.transpose %37, [1, 0, 2] : vector<4x8x8xf32> -> vector<8x4x8xf32>
    %39 = vector.shape_cast %38 : vector<8x4x8xf32> to vector<8x32xf32>
    %40 = arith.truncf %39 : vector<8x32xf32> to vector<8x32xbf16>
    %c0_21 = arith.constant 0 : index
    %c0_22 = arith.constant 0 : index
    %41 = vector.load %arg6[%c0_21, %c0_22] : memref<32x32xbf16, #tpu.memory_space<vmem>>, vector<32x32xbf16>
    %cst_23 = arith.constant dense<0.000000e+00> : vector<8x32xf32>
    %42 = tpu.matmul %40, %41, %cst_23 {dimension_numbers = #tpu.dot_dimension_numbers<[1], [0], [0], [1], [0, 0, 1, 1], [], []>} : vector<8x32xbf16>, vector<32x32xbf16>, vector<8x32xf32> -> vector<8x32xf32>
    %c0_24 = arith.constant 0 : index
    %c0_25 = arith.constant 0 : index
    %43 = vector.load %arg7[%c0_24, %c0_25] : memref<1x32xf32, #tpu.memory_space<vmem>>, vector<1x32xf32>
    %44 = vector.broadcast %43 : vector<1x32xf32> to vector<8x32xf32>
    %45 = arith.addf %42, %44 : vector<8x32xf32>
    %46 = arith.addf %45, %7 : vector<8x32xf32>
    %c0_26 = arith.constant 0 : index
    %c0_27 = arith.constant 0 : index
    %47 = vector.load %arg8[%c0_26, %c0_27] : memref<1x32xf32, #tpu.memory_space<vmem>>, vector<1x32xf32>
    %c0_28 = arith.constant 0 : index
    %c0_29 = arith.constant 0 : index
    %48 = vector.load %arg9[%c0_28, %c0_29] : memref<1x32xf32, #tpu.memory_space<vmem>>, vector<1x32xf32>
    %cst_30 = arith.constant dense<0.000000e+00> : vector<8xf32>
    %49 = vector.multi_reduction <add>, %46, %cst_30 [1] : vector<8x32xf32> to vector<8xf32>
    %50 = vector.shape_cast %49 : vector<8xf32> to vector<8x1xf32>
    %cst_31 = arith.constant 3.200000e+01 : f32
    %51 = vector.broadcast %cst_31 : f32 to vector<8x1xf32>
    %52 = arith.divf %50, %51 : vector<8x1xf32>
    %53 = vector.broadcast %52 : vector<8x1xf32> to vector<8x32xf32>
    %54 = arith.subf %46, %53 : vector<8x32xf32>
    %55 = arith.mulf %54, %54 : vector<8x32xf32>
    %cst_32 = arith.constant dense<0.000000e+00> : vector<8xf32>
    %56 = vector.multi_reduction <add>, %55, %cst_32 [1] : vector<8x32xf32> to vector<8xf32>
    %57 = vector.shape_cast %56 : vector<8xf32> to vector<8x1xf32>
    %cst_33 = arith.constant 3.200000e+01 : f32
    %58 = vector.broadcast %cst_33 : f32 to vector<8x1xf32>
    %59 = arith.divf %57, %58 : vector<8x1xf32>
    %cst_34 = arith.constant 9.99999996E-13 : f32
    %60 = vector.broadcast %cst_34 : f32 to vector<8x1xf32>
    %61 = arith.addf %59, %60 : vector<8x1xf32>
    %62 = math.rsqrt %61 : vector<8x1xf32>
    %63 = vector.broadcast %62 : vector<8x1xf32> to vector<8x32xf32>
    %64 = arith.mulf %54, %63 : vector<8x32xf32>
    %65 = vector.broadcast %47 : vector<1x32xf32> to vector<8x32xf32>
    %66 = arith.mulf %64, %65 : vector<8x32xf32>
    %67 = vector.broadcast %48 : vector<1x32xf32> to vector<8x32xf32>
    %68 = arith.addf %66, %67 : vector<8x32xf32>
    %69 = arith.truncf %68 : vector<8x32xf32> to vector<8x32xbf16>
    %c0_35 = arith.constant 0 : index
    %c0_36 = arith.constant 0 : index
    %70 = vector.load %arg10[%c0_35, %c0_36] : memref<32x64xbf16, #tpu.memory_space<vmem>>, vector<32x64xbf16>
    %cst_37 = arith.constant dense<0.000000e+00> : vector<8x64xf32>
    %71 = tpu.matmul %69, %70, %cst_37 {dimension_numbers = #tpu.dot_dimension_numbers<[1], [0], [0], [1], [0, 0, 1, 1], [], []>} : vector<8x32xbf16>, vector<32x64xbf16>, vector<8x64xf32> -> vector<8x64xf32>
    %c0_38 = arith.constant 0 : index
    %c0_39 = arith.constant 0 : index
    %72 = vector.load %arg11[%c0_38, %c0_39] : memref<1x64xf32, #tpu.memory_space<vmem>>, vector<1x64xf32>
    %73 = vector.broadcast %72 : vector<1x64xf32> to vector<8x64xf32>
    %74 = arith.addf %71, %73 : vector<8x64xf32>
    %cst_40 = arith.constant 5.000000e-01 : f32
    %75 = vector.broadcast %cst_40 : f32 to vector<8x64xf32>
    %76 = arith.mulf %75, %74 : vector<8x64xf32>
    %cst_41 = arith.constant 0.707106769 : f32
    %77 = vector.broadcast %cst_41 : f32 to vector<8x64xf32>
    %78 = arith.mulf %74, %77 : vector<8x64xf32>
    %79 = math.erf %78 : vector<8x64xf32>
    %cst_42 = arith.constant 1.000000e+00 : f32
    %80 = vector.broadcast %cst_42 : f32 to vector<8x64xf32>
    %81 = arith.addf %80, %79 : vector<8x64xf32>
    %82 = arith.mulf %76, %81 : vector<8x64xf32>
    %83 = arith.truncf %82 : vector<8x64xf32> to vector<8x64xbf16>
    %c0_43 = arith.constant 0 : index
    %c0_44 = arith.constant 0 : index
    %84 = vector.load %arg12[%c0_43, %c0_44] : memref<64x32xbf16, #tpu.memory_space<vmem>>, vector<64x32xbf16>
    %cst_45 = arith.constant dense<0.000000e+00> : vector<8x32xf32>
    %85 = tpu.matmul %83, %84, %cst_45 {dimension_numbers = #tpu.dot_dimension_numbers<[1], [0], [0], [1], [0, 0, 1, 1], [], []>} : vector<8x64xbf16>, vector<64x32xbf16>, vector<8x32xf32> -> vector<8x32xf32>
    %c0_46 = arith.constant 0 : index
    %c0_47 = arith.constant 0 : index
    %86 = vector.load %arg13[%c0_46, %c0_47] : memref<1x32xf32, #tpu.memory_space<vmem>>, vector<1x32xf32>
    %87 = vector.broadcast %86 : vector<1x32xf32> to vector<8x32xf32>
    %88 = arith.addf %85, %87 : vector<8x32xf32>
    %89 = arith.addf %88, %68 : vector<8x32xf32>
    %c0_48 = arith.constant 0 : index
    %c0_49 = arith.constant 0 : index
    %90 = vector.load %arg14[%c0_48, %c0_49] : memref<1x32xf32, #tpu.memory_space<vmem>>, vector<1x32xf32>
    %c0_50 = arith.constant 0 : index
    %c0_51 = arith.constant 0 : index
    %91 = vector.load %arg15[%c0_50, %c0_51] : memref<1x32xf32, #tpu.memory_space<vmem>>, vector<1x32xf32>
    %cst_52 = arith.constant dense<0.000000e+00> : vector<8xf32>
    %92 = vector.multi_reduction <add>, %89, %cst_52 [1] : vector<8x32xf32> to vector<8xf32>
    %93 = vector.shape_cast %92 : vector<8xf32> to vector<8x1xf32>
    %cst_53 = arith.constant 3.200000e+01 : f32
    %94 = vector.broadcast %cst_53 : f32 to vector<8x1xf32>
    %95 = arith.divf %93, %94 : vector<8x1xf32>
    %96 = vector.broadcast %95 : vector<8x1xf32> to vector<8x32xf32>
    %97 = arith.subf %89, %96 : vector<8x32xf32>
    %98 = arith.mulf %97, %97 : vector<8x32xf32>
    %cst_54 = arith.constant dense<0.000000e+00> : vector<8xf32>
    %99 = vector.multi_reduction <add>, %98, %cst_54 [1] : vector<8x32xf32> to vector<8xf32>
    %100 = vector.shape_cast %99 : vector<8xf32> to vector<8x1xf32>
    %cst_55 = arith.constant 3.200000e+01 : f32
    %101 = vector.broadcast %cst_55 : f32 to vector<8x1xf32>
    %102 = arith.divf %100, %101 : vector<8x1xf32>
    %cst_56 = arith.constant 9.99999996E-13 : f32
    %103 = vector.broadcast %cst_56 : f32 to vector<8x1xf32>
    %104 = arith.addf %102, %103 : vector<8x1xf32>
    %105 = math.rsqrt %104 : vector<8x1xf32>
    %106 = vector.broadcast %105 : vector<8x1xf32> to vector<8x32xf32>
    %107 = arith.mulf %97, %106 : vector<8x32xf32>
    %108 = vector.broadcast %90 : vector<1x32xf32> to vector<8x32xf32>
    %109 = arith.mulf %107, %108 : vector<8x32xf32>
    %110 = vector.broadcast %91 : vector<1x32xf32> to vector<8x32xf32>
    %111 = arith.addf %109, %110 : vector<8x32xf32>
    %c0_57 = arith.constant 0 : index
    %c0_58 = arith.constant 0 : index
    %c0_59 = arith.constant 0 : index
    %112 = vector.load %arg16[%c0_57, %c0_58, %c0_59] : memref<1x8x32xf32, #tpu.memory_space<vmem>>, vector<1x8x32xf32>
    %113 = vector.shape_cast %112 : vector<1x8x32xf32> to vector<8x32xf32>
    %114 = vector.shape_cast %111 : vector<8x32xf32> to vector<1x8x32xf32>
    tpu.vector_store %arg16[%c0_57, %c0_58, %c0_59], %114 {strides = array<i32>} : memref<1x8x32xf32, #tpu.memory_space<vmem>>, vector<1x8x32xf32>,
    return
  }
  func.func @transform_0(%arg0: i32, %arg1: i32) -> (i32, i32, i32, i32) {
    %c0_i32 = arith.constant 0 : i32
    %c0_i32_0 = arith.constant 0 : i32
    %c0_i32_1 = arith.constant 0 : i32
    %c0_i32_2 = arith.constant 0 : i32
    return %arg0, %c0_i32, %c0_i32_0, %c0_i32_1 : i32, i32, i32, i32
  }
  func.func @transform_1(%arg0: i32, %arg1: i32) -> (i32, i32, i32) {
    %c0_i32 = arith.constant 0 : i32
    %c0_i32_0 = arith.constant 0 : i32
    %c0_i32_1 = arith.constant 0 : i32
    return %arg0, %c0_i32, %c0_i32_0 : i32, i32, i32
  }
  func.func @transform_2(%arg0: i32, %arg1: i32) -> (i32, i32) {
    %c0_i32 = arith.constant 0 : i32
    %c0_i32_0 = arith.constant 0 : i32
    %c0_i32_1 = arith.constant 0 : i32
    return %c0_i32, %c0_i32_0 : i32, i32
  }
  func.func @transform_3(%arg0: i32, %arg1: i32) -> (i32, i32) {
    %c0_i32 = arith.constant 0 : i32
    %c0_i32_0 = arith.constant 0 : i32
    %c0_i32_1 = arith.constant 0 : i32
    return %c0_i32, %c0_i32_0 : i32, i32
  }
  func.func @transform_4(%arg0: i32, %arg1: i32) -> (i32, i32) {
    %c0_i32 = arith.constant 0 : i32
    %c0_i32_0 = arith.constant 0 : i32
    %c0_i32_1 = arith.constant 0 : i32
    return %c0_i32, %c0_i32_0 : i32, i32
  }
  func.func @transform_5(%arg0: i32, %arg1: i32) -> (i32, i32) {
    %c0_i32 = arith.constant 0 : i32
    %c0_i32_0 = arith.constant 0 : i32
    %c0_i32_1 = arith.constant 0 : i32
    return %c0_i32, %c0_i32_0 : i32, i32
  }
  func.func @transform_6(%arg0: i32, %arg1: i32) -> (i32, i32) {
    %c0_i32 = arith.constant 0 : i32
    %c0_i32_0 = arith.constant 0 : i32
    %c0_i32_1 = arith.constant 0 : i32
    return %c0_i32, %c0_i32_0 : i32, i32
  }
  func.func @transform_7(%arg0: i32, %arg1: i32) -> (i32, i32) {
    %c0_i32 = arith.constant 0 : i32
    %c0_i32_0 = arith.constant 0 : i32
    %c0_i32_1 = arith.constant 0 : i32
    return %c0_i32, %c0_i32_0 : i32, i32
  }
  func.func @transform_8(%arg0: i32, %arg1: i32) -> (i32, i32) {
    %c0_i32 = arith.constant 0 : i32
    %c0_i32_0 = arith.constant 0 : i32
    %c0_i32_1 = arith.constant 0 : i32
    return %c0_i32, %c0_i32_0 : i32, i32
  }
  func.func @transform_9(%arg0: i32, %arg1: i32) -> (i32, i32) {
    %c0_i32 = arith.constant 0 : i32
    %c0_i32_0 = arith.constant 0 : i32
    %c0_i32_1 = arith.constant 0 : i32
    return %c0_i32, %c0_i32_0 : i32, i32
  }
  func.func @transform_10(%arg0: i32, %arg1: i32) -> (i32, i32) {
    %c0_i32 = arith.constant 0 : i32
    %c0_i32_0 = arith.constant 0 : i32
    %c0_i32_1 = arith.constant 0 : i32
    return %c0_i32, %c0_i32_0 : i32, i32
  }
  func.func @transform_11(%arg0: i32, %arg1: i32) -> (i32, i32) {
    %c0_i32 = arith.constant 0 : i32
    %c0_i32_0 = arith.constant 0 : i32
    %c0_i32_1 = arith.constant 0 : i32
    return %c0_i32, %c0_i32_0 : i32, i32
  }
  func.func @transform_12(%arg0: i32, %arg1: i32) -> (i32, i32) {
    %c0_i32 = arith.constant 0 : i32
    %c0_i32_0 = arith.constant 0 : i32
    %c0_i32_1 = arith.constant 0 : i32
    return %c0_i32, %c0_i32_0 : i32, i32
  }
  func.func @transform_13(%arg0: i32, %arg1: i32) -> (i32, i32) {
    %c0_i32 = arith.constant 0 : i32
    %c0_i32_0 = arith.constant 0 : i32
    %c0_i32_1 = arith.constant 0 : i32
    return %c0_i32, %c0_i32_0 : i32, i32
  }
  func.func @transform_14(%arg0: i32, %arg1: i32) -> (i32, i32, i32) {
    %c0_i32 = arith.constant 0 : i32
    %c0_i32_0 = arith.constant 0 : i32
    return %arg0, %arg1, %c0_i32 : i32, i32, i32
  }
}

</mosaic_0001>

<bundles_post_ra>
// kernel: tpu_custom_call.1
= control target key start
LH: loop header
LB: loop body
LE: loop exit
PB: predicated region body
PF: predicated region fallthrough
CT: control target
= control target key end

     0   :  { %s3141_s0 = inlined_call_operand.hbm [shape: f32[2,1,1,8], index: 0, kind: input, shape index: {}]   ;;  %s3142_s1 = inlined_call_operand.vmem [shape: f32[2,8,32], index: 1, kind: input, shape index: {}]   ;;  %s3143_s2 = inlined_call_operand.vmem [shape: bf16[32,96], index: 2, kind: input, shape index: {}]   ;;  %s3144_s3 = inlined_call_operand.vmem [shape: f32[1,96], index: 3, kind: input, shape index: {}]   ;;  %s3145_s4 = inlined_call_operand.vmem [shape: bf16[32,32], index: 4, kind: input, shape index: {}]   ;;  %s3146_s5 = inlined_call_operand.vmem [shape: f32[1,32], index: 5, kind: input, shape index: {}]   ;;  %s3147_s6 = inlined_call_operand.vmem [shape: f32[1,32], index: 6, kind: input, shape index: {}]   ;;  %s3148_s7 = inlined_call_operand.vmem [shape: f32[1,32], index: 7, kind: input, shape index: {}]   ;;  %s3149_s8 = inlined_call_operand.hbm [shape: bf16[32,64], index: 8, kind: input, shape index: {}]   ;;  %s3150_s9 = inlined_call_operand.vmem [shape: f32[1,64], index: 9, kind: input, shape index: {}]   ;;  %s3151_s10 = inlined_call_operand.vmem [shape: bf16[64,32], index: 10, kind: input, shape index: {}]   ;;  %s3152_s11 = inlined_call_operand.vmem [shape: f32[1,32], index: 11, kind: input, shape index: {}]   ;;  %s3153_s12 = inlined_call_operand.vmem [shape: f32[1,32], index: 12, kind: input, shape index: {}]   ;;  %s3154_s13 = inlined_call_operand.vmem [shape: f32[1,32], index: 13, kind: input, shape index: {}]   ;;  %s3155_s14 = inlined_call_operand.hbm [shape: f32[2,8,32], index: 14, kind: output, shape index: {}]  }
   0x1   :  { %3164 = sst [smem:[#allocation16_spill]] %s3141_s0 }
   0x2   :  { %3165 = sst [smem:[#allocation17_spill]] %s3149_s8 }
   0x3   :  { %3166 = sst [smem:[#allocation18_spill]] %s3152_s11 }
   0x4   :  { %3167 = sst [smem:[#allocation19_spill]] %s3153_s12 }
   0x5   :  { %3168 = sst [smem:[#allocation20_spill]] %s3154_s13 }
   0x6   :  { %3169 = sst [smem:[#allocation21_spill]] %s3155_s14 }
   0x7   :  { %19 = vsyncpa [#allocation5], 0 }
   0x8   :  { %21 = vsyncpa [#allocation5 + $0x1], 0 }
   0x9   :  { %22 = vsyncpa [#allocation8], 0 }
   0xa   :  { %23 = vsyncpa [#allocation6], 0 }
   0xb   :  { %25 = vsyncpa [#allocation6 + $0x1], 0  ;;  %s2664_s29 = smov 0   ;;  %s2666_s30 = smov 0  }
   0xc   :  { %s2668_s15 = smov 0   ;;  %s2670_s16 = smov 0  }
   0xd   :  { %s2672_s17 = smov 0   ;;  %s2674_s18 = smov 0  }
   0xe LB: > { %3170 = sst [smem:[#allocation13_spill]] %s2551_s29  ;;  %s2125_s19 = sadd.s32 4294967295, %s2571_s18   ;;  %s2571_s18 = sphi %s2674_s18, %s31_s18   ;;  %s2567_s17 = sphi %s2672_s17, %s3200_s17   ;;  %s2563_s16 = sphi %s2670_s16, %s3199_s16   ;;  %s2559_s15 = sphi %s2668_s15, %s3198_s15   ;;  %s2555_s30 = sphi %s2666_s30, %s3197_s30   ;;  %s2551_s29 = sphi %s2664_s29, %s3196_s29  }
   0xf   : > { %s2126_s20 = sadd.s32 4294967294, %s2571_s18   ;;  %p63_p0 = scmp.ne.s32.totalorder %s2555_s30, %s2551_s29 }
  0x10   : > { %p2698_p1 = scmp.eq.s32.totalorder %s2125_s19, 0  ;;  %p2702_p2 = scmp.eq.s32.totalorder %s2125_s19, 1 }
  0x11   : > { %p373_p3 = scmp.eq.s32.totalorder %s2126_s20, 1  ;;  %p2127_p5 = scmp.ge.s32.totalorder %s2571_s18, 1 }
  0x12   : > { %s3171_s21 = scalar_select %p2698_p1, 1, 0 }
  0x13   : > { %s3172_s22 = scalar_select %p2702_p2, 1, 0 }
  0x14   : > { %p2708_p4 = por %p2698_p1, %p63_p0  ;;  %p2713_p6 = por %p373_p3, %p63_p0 }
  0x15   : > { %p380_p7 = scmp.lt.s32.totalorder %s2571_s18, 3  ;;  %s2573_s26 = smov [#allocation7]  }
  0x16   : > { %s3173_s23 = scalar_select %p2708_p4, 1, 0 }
  0x17   : > { %s3174_s24 = scalar_select %p2713_p6, 1, 0 }
  0x18   : > { %p2718_p8 = pnand %p2127_p5, %p380_p7  ;;  %s410_s27 = sshll.u32 %s2573_s26, 4  ;;  %s411_s27 = int_to_ptr.vmem [resolvable:$true] %s410_s27 }
  0x19   : > { %3175 = sst [smem:[#allocation14_spill]] %s3174_s24  ;;  %s43_s19 = sadd.s32 1, %s2567_s17 }
  0x1a   : > { %s3176_s25 = scalar_select %p2718_p8, 1, 0 }
  0x1b   : > { %p2315_p9 = pneg %p2718_p8  ;;  %s3178_s8 = sld [smem:[#allocation17_spill]] }
  0x1d   : > { %p2727_p11 = pnand %p2315_p9, %p2698_p1 }
  0x1f   : > { %p2429_p13 = pneg %p2727_p11 }
  0x21   : > { %s2427_s29 = scalar_lea.hbm %s3178_s8, 256 }
  0x22   : > { %p2428_p12 = scmp.ne.s32.totalorder %s3178_s8, %s2427_s29  ;;  %p2434_p5 = scmp.lt.u32.totalorder %s2427_s29, %s3178_s8 }
  0x24   : > { %p2430_p0 = pnand %p2429_p13, %p2428_p12 }
  0x26   : > { %p2431_p3 = pneg %p2430_p0 }
  0x28   : > { %p2436_p7 = pnand %p2434_p5, %p2431_p3 }
  0x2a   : > { %2439 = shalt.err (!%p2436_p7)
}
  0x2b   : > { %s2440_s11 = scalar_lea.vmem %s411_s27, 256  ;;  %p2448_p1 = scmp.lt.s32.totalorder %s411_s27, %s411_s27 }
  0x2c   : > { %p2441_p9 = scmp.ne.s32.totalorder %s411_s27, %s2440_s11  ;;  %p2449_p4 = scmp.lt.s32.totalorder %s2440_s11, %s2440_s11 }
  0x2e   : > { %p2443_p10 = pnand %p2441_p9, %p2429_p13  ;;  %p2450_p8 = por %p2449_p4, %p2448_p1 }
  0x30   : > { %p2444_p6 = pneg %p2443_p10 }
  0x32   : > { %p2451_p2 = pnand %p2450_p8, %p2444_p6 }
  0x34   : > { %2454 = shalt.err (!%p2451_p2)
}
  0x35   : > { %s2574_s13 = smov 64   ;;  %s2575_s12 = smov 4  }
  0x36   : > { %2318 = dma.hbm_to_vmem [thread:$0]  (!%p2727_p11), %s3178_s8, 256, %s411_s27, [#allocation8], %s2574_s13, %s2574_s13, %s2575_s12  }
  0x37   : > { %p45_p1 = scmp.ge.s32.totalorder %s43_s19, 2  ;;  %p57_p2 = scmp.ne.s32.totalorder %s2559_s15, %s2555_s30 }
  0x38   : > { %p58_p4 = scmp.eq.s32.totalorder %s2571_s18, 0  ;;  %s50_s11 = sadd.s32 1, %s2559_s15 }
  0x39   : > { %s3202_s19 = smov (%p45_p1, %s43_s19), 0  ;;  %p3180_p6 = scmp.ne.s32.totalorder %s3172_s22, 0 }
  0x3a   : > { %3179 = sst [smem:[#allocation15_spill]] %s3202_s19  ;;  %s47_s20 = ssub.s32 %s2567_s17, %s3202_s19 }
  0x3b   : > { %p2756_p8 = por %p3180_p6, %p57_p2  ;;  %p59_p10 = por %p58_p4, %p57_p2 }
  0x3c   : > { %p48_p12 = scmp.eq.s32.totalorder %s47_s20, 0  ;;  %s439_s28 = sand.u32 1, %s2559_s15  }
  0x3d   : > { %p2328_p13 = scmp.lt.s32.totalorder %s2571_s18, 2  ;;  %s2130_s27 = sshll.u32 %s2567_s17, 4 }
  0x3e   : > { %s2765_s26 = scalar_select %p48_p12, %s2559_s15, %s50_s11  }
  0x3f   : > { %s442_s13 = scalar_lea.vmem [#allocation4], %s439_s28  ;;  %s3182_s0 = sld [smem:[#allocation16_spill]] }
  0x40   : > { %s449_s12 = sshll.u32 %s442_s13, 4  ;;  %p2775_p11 = pnand %p2328_p13, %p59_p10  ;;  %s2773_s12 = int_to_ptr.vmem [resolvable:$true] %s449_s12 }
  0x41   : > { %s440_s11 = scalar_lea.sflag [#allocation5], %s439_s28 }
  0x42   : > { %p2457_p3 = pneg %p2775_p11 }
  0x45   : > { %s2771_s8 = scalar_lea.hbm %s3182_s0, %s2130_s27  ;;  %s2460_s14 = scalar_lea.hbm %s3182_s0, 32 }
  0x46   : > { %s2455_s20 = scalar_lea.hbm %s2771_s8, 16  ;;  %p2461_p9 = scmp.lt.u32.totalorder %s2771_s8, %s3182_s0 }
  0x47   : > { %p2456_p0 = scmp.ne.s32.totalorder %s2771_s8, %s2455_s20  ;;  %p2462_p1 = scmp.lt.u32.totalorder %s2460_s14, %s2455_s20 }
  0x48   : > { %p2464_p4 = scmp.lt.u32.totalorder %s2455_s20, %s2771_s8 }
  0x49   : > { %p2458_p5 = pnand %p2457_p3, %p2456_p0  ;;  %p2463_p2 = por %p2462_p1, %p2461_p9 }
  0x4b   : > { %p2459_p7 = pneg %p2458_p5  ;;  %p2465_p6 = por %p2464_p4, %p2463_p2 }
  0x4d   : > { %p2466_p10 = pnand %p2465_p6, %p2459_p7 }
  0x4f   : > { %2469 = shalt.err (!%p2466_p10)
}
  0x50   : > { %s2470_s28 = scalar_lea.vmem %s2773_s12, 16  ;;  %s2576_s27 = smov [#allocation4]  }
  0x51   : > { %p2471_p12 = scmp.ne.s32.totalorder %s2773_s12, %s2470_s28  ;;  %s2475_s13 = sshll.u32 %s2576_s27, 4  ;;  %s2476_s13 = int_to_ptr.vmem [resolvable:$false] %s2475_s13 }
  0x52   : > { %s2477_s19 = scalar_lea.vmem %s2476_s13, 32  ;;  %p2478_p5 = scmp.lt.s32.totalorder %s2773_s12, %s2476_s13 }
  0x53   : > { %p2473_p13 = pnand %p2471_p12, %p2457_p3  ;;  %p2479_p9 = scmp.lt.s32.totalorder %s2477_s19, %s2470_s28 }
  0x55   : > { %p2474_p0 = pneg %p2473_p13  ;;  %p2480_p1 = por %p2479_p9, %p2478_p5 }
  0x57   : > { %p2481_p2 = pnand %p2480_p1, %p2474_p0 }
  0x59   : > { %2484 = shalt.err (!%p2481_p2)
}
  0x5a   : > { %2322 = dma.hbm_to_vmem [thread:$0]  (!%p2775_p11), %s2771_s8, 16, %s2773_s12, %s440_s11  }
  0x5b   : > { %p3184_p7 = scmp.ne.s32.totalorder %s3176_s25, 0 }
  0x5c   : > { %s2807_s20 = sand.u32 (!%p3184_p7), 1, %s2555_s30   ;;  %p3185_p3 = scmp.ne.s32.totalorder (!%p3184_p7), %s3173_s23, 0 }
  0x5d   : > { %465 = sbr.rel (%p3184_p7) target bundleno = 2797 (0xaed), region = 76  ;;  %s468_s14 = scalar_lea.sflag (!%p3184_p7), [#allocation5], %s2807_s20 }
  0x5e   : > { %s470_s29 = scalar_lea.vmem (!%p3184_p7), [#allocation4], %s2807_s20 }
  0x64   : > { %2538 = dma.done.wait (%p3185_p3), %s468_s14, 16  }
  0x65   : > { %2540 = vsyncadd (%p3185_p3), %s468_s14, 4294967280  ;;  %p3186_p4 = scmp.ne.s32.totalorder %s3171_s21, 0 }
  0x67   : > { %2542 = dma.done.wait (%p3186_p4), [#allocation8], 256  }
  0x68   : > { %2544 = vsyncadd (%p3186_p4), [#allocation8], 4294967040  ;;  %v2577_v0 = vmov 0.0   ;;  %vm2578_vm0 = vmmov 0   ;;  %v2393_v1 = vld [vmem:[%s3143_s2] sm:$0xff]   ;;  %s2579_s21 = smov 96   ;;  %v621_v24 = vlaneseq }
  0x69   : > { %2215 = vmatprep.subr.bf16.mxu1 %v2577_v0  ;;  %2219 = vmatprep.mubr.msk.bf16.mxu1 %vm2578_vm0, %v2577_v0  ;;  %v2394_v2 = vld [vmem:[%s3143_s2 + $0x8] sm:$0xff]   ;;  %v2135_v3 = vld [vmem:[%s3144_s3] ss:$0 sm:$0xff]  ;;  %p522_p11 = scmp.lt.s32.totalorder %s2563_s16, 1  ;;  %vm562_vm1 = vcmask 261120   ;;  %s2580_s22 = smov 112  }
  0x6a   : > { %2231 = vmatprep.subr.bf16.mxu0 %v2577_v0  ;;  %2233 = vmatprep.mubr.msk.bf16.mxu0 %vm2578_vm0, %v2577_v0  ;;  %v2395_v8 = vld [vmem:[%s3143_s2] sm:$0xff]   ;;  %v2396_v9 = vld [vmem:[%s3143_s2 + $0x8] sm:$0xff]   ;;  %s2581_s11 = smov 120   ;;  %v2583_v22 = vmov 1983009808   ;;  %v622_v28 = vshrl.u32 %v621_v24, 7 }
  0x6b   : > { %553 = vrot.lane.b32.xlu0 %v2393_v1, %s2579_s21  ;;  %559 = vrot.lane.b32.xlu1 %v2135_v3, %s2579_s21  ;;  %s523_s28 = scalar_select %p522_p11, %s2563_s16, 1  ;;  %v619_v23 = vunpack.c.l.s4 %v2583_v22  ;;  %v2584_v25 = vmov 1934713408   ;;  %vm836_vm2 = vcmask 60416   ;;  %vm1150_vm3 = vcmask 64512  }
  0x6c   : > { %v651_v26 = vunpack.c.l.s4 %v2584_v25  ;;  %vm1390_vm4 = vcmask 1043456   ;;  %s2585_s19 = smov 16   ;;  %s2587_s8 = smov 24   ;;  %vm1721_vm5 = vcmask 130048   ;;  %vm1723_vm6 = vcmask 195584  }
  0x6d   : > { %s2134_s27 = sshll.u32 %s523_s28, 3  ;;  %s2582_s28 = smov 104   ;;  %v620_v27 = vunpack.c.0.s8 %v619_v23  ;;  %vm1935_vm7 = vcmask 523264  }
  0x6e   : > { %s525_s14 = scalar_lea.vmem %s3142_s1, %s2134_s27  ;;  %v652_v31 = vunpack.c.0.s8 %v651_v26  ;;  %s3188_s13 = sld [smem:[#allocation19_spill]] }
  0x6f   : > { %555 = vrot.lane.b32.xlu0 %v2394_v2, %s2579_s21  ;;  %v2842_v5 = vld [vmem:[%s525_s14] sm:$0xff]  ;;  %v2871_v32 = vsub.s32 %v620_v27, %v622_v28  ;;  %s2586_s14 = smov 8   ;;  %s2179_s23 = sshll.u32 %s2563_s16, 7 }
  0x70   : > { %v532_v7 = vpack.c.bf16 %v2842_v5, %v2842_v5  ;;  %v2883_v38 = vsub.s32 %v652_v31, %v622_v28  ;;  %s2588_s16 = smov [#allocation9]  }
  0xdd   : > { %v554_v4 = vpop.permute.xlu0 %553  ;;  %v560_v10 = vpop.permute.xlu1 %559 }
  0xde   : > { %2216 = vmatpush3.bf16.msra.mxu1 %v554_v4 }
  0xdf   : > { %2217 = vmatprep.subr.bf16.mxu1 %v2577_v0 }
  0xe1   : > { %v556_v6 = vpop.permute.xlu0 %555 }
  0xe2   : > { %2218 = vmatpush3.bf16.msra.mxu1 %v556_v6 }
  0xe3   : > { %2223 = vmatprep.subr.bf16.mxu1 %v2577_v0 }
  0xe5   : > { %2220 = vmatmul.mubr.msk.bf16.vlgmr.msra.gmra.mrb[0].mxu1 %vm562_vm1, %v532_v7 }
  0xe6   : > { %2224 = vmatpush3.bf16.msra.mxu1 %v2395_v8  ;;  %2227 = vmatprep.mubr.msk.bf16.mxu1 %vm2578_vm0, %v2577_v0 }
  0xe7   : > { %2225 = vmatprep.subr.bf16.mxu1 %v2577_v0 }
  0xea   : > { %2226 = vmatpush3.bf16.msra.mxu1 %v2396_v9 }
  0xeb   : > { %2237 = vmatprep.subr.bf16.mxu1 %v2577_v0 }
  0xed   : > { %2228 = vmatmul.mubr.msk.bf16.vlgmr.msra.gmra.mrb[4].mxu1 %vm562_vm1, %v532_v7 }
  0xee   : > { %2239 = vmatprep.mubr.msk.bf16.mxu1 %vm2578_vm0, %v2577_v0 }
 0x1b8   : > { %v600_v11 = vpop.f32.mrb[0].mxu1 }
 0x1b9   : > { %v2862_v12 = vadd.f32 %v600_v11, %v560_v10  ;;  %v2221_v13 = vpop.f32.mrb[1].mxu1 }
 0x1ba   : > { %v603_v14 = vpop.f32.mrb[2].mxu1 }
 0x1bb   : > { %610 = vrot.lane.b32.xlu0 %v2862_v12, %s2580_s22  ;;  %607 = vrot.lane.b32.xlu1 %v2862_v12, %s2581_s11  ;;  %v2222_v15 = vpop.f32.mrb[3].mxu1 }
 0x1bf   : > { %613 = vrot.lane.b32.xlu1 %v2862_v12, %s2582_s28 }
 0x1c0   : > { %v983_v16 = vpop.f32.mrb[4].mxu1 }
 0x1c1   : > { %v984_v17 = vadd.f32 %v2135_v3, %v983_v16  ;;  %v2229_v18 = vpop.f32.mrb[5].mxu1 }
 0x1c2   : > { %v986_v19 = vpop.f32.mrb[6].mxu1 }
 0x1c3   : > { %v989_v20 = vmul.f32 0.35355338, %v984_v17  ;;  %v2230_v21 = vpop.f32.mrb[7].mxu1 }
 0x1c5   : > { %994 = vrot.lane.b32.xlu1 %v989_v20, %s2580_s22  ;;  %991 = vrot.lane.b32.xlu0 %v989_v20, %s2581_s11 }
 0x1c9   : > { %997 = vrot.lane.b32.xlu0 %v989_v20, %s2582_s28  ;;  %s3187_s28 = sld [smem:[#allocation18_spill]] }
 0x22d   : > { %v2867_v29 = vpop.permute.xlu0 %610  ;;  %v2869_v30 = vpop.permute.xlu1 %607 }
 0x22e   : > { %v616_v33 = vcombine.low %v2862_v12, %v2867_v29  ;;  %v617_v34 = vcombine.high %v2862_v12, %v2867_v29 }
 0x230   : > { %v624_v39 = vrot.slane %v616_v33, %v2871_v32  ;;  %v631_v40 = vrot.slane %v617_v34, %v2871_v32 }
 0x231   : > { %v2877_v35 = vpop.permute.xlu1 %613 }
 0x232   : > { %v632_v36 = vcombine.low %v2869_v30, %v2877_v35  ;;  %v633_v37 = vcombine.high %v2869_v30, %v2877_v35 }
 0x234   : > { %v640_v41 = vrot.slane %v632_v36, %v2871_v32  ;;  %v647_v42 = vrot.slane %v633_v37, %v2871_v32 }
 0x236   : > { %v648_v43 = vcombine.low %v624_v39, %v640_v41  ;;  %v649_v44 = vcombine.high %v624_v39, %v640_v41  ;;  %v664_v45 = vcombine.low %v631_v40, %v647_v42  ;;  %v665_v46 = vcombine.high %v631_v40, %v647_v42 }
 0x237   : > { %v992_v47 = vpop.permute.xlu0 %991  ;;  %v995_v52 = vpop.permute.xlu1 %994 }
 0x238   : > { %v656_v48 = vrot.slane %v648_v43, %v2883_v38  ;;  %v663_v49 = vrot.slane %v649_v44, %v2883_v38  ;;  %v672_v50 = vrot.slane %v664_v45, %v2883_v38  ;;  %v679_v51 = vrot.slane %v665_v46, %v2883_v38 }
 0x239   : > { %v1000_v57 = vcombine.low %v989_v20, %v995_v52  ;;  %v1001_v58 = vcombine.high %v989_v20, %v995_v52 }
 0x23a   : > { %v764_v53 = vcombine.low %v656_v48, %v663_v49  ;;  %v2139_v54 = vcombine.high %v656_v48, %v663_v49  ;;  %v780_v55 = vcombine.low %v672_v50, %v679_v51  ;;  %v2140_v56 = vcombine.high %v672_v50, %v679_v51 }
 0x23b   : > { %v998_v59 = vpop.permute.xlu0 %997  ;;  %v1008_v8 = vrot.slane %v1000_v57, %v2871_v32  ;;  %v1015_v9 = vrot.slane %v1001_v58, %v2871_v32 }
 0x23c   : > { %v771_v60 = vrot.slane %v764_v53, %v2871_v32  ;;  %v779_v61 = vrot.slane %v2139_v54, %v2871_v32  ;;  %v787_v62 = vrot.slane %v780_v55, %v2871_v32  ;;  %v795_v63 = vrot.slane %v2140_v56, %v2871_v32 }
 0x23d   : > { %v1016_v1 = vcombine.low %v992_v47, %v998_v59  ;;  %v1017_v2 = vcombine.high %v992_v47, %v998_v59 }
 0x23e   : > { %v796_v3 = vcombine.low %v771_v60, %v779_v61  ;;  %v797_v4 = vcombine.high %v771_v60, %v779_v61  ;;  %v812_v6 = vcombine.low %v787_v62, %v795_v63  ;;  %v813_v7 = vcombine.high %v787_v62, %v795_v63 }
 0x23f   : > { %v1024_v10 = vrot.slane %v1016_v1, %v2871_v32  ;;  %v1031_v11 = vrot.slane %v1017_v2, %v2871_v32 }
 0x240   : > { %v804_v13 = vrot.slane %v796_v3, %v2883_v38  ;;  %v811_v14 = vrot.slane %v797_v4, %v2883_v38  ;;  %v820_v15 = vrot.slane %v812_v6, %v2883_v38  ;;  %v827_v16 = vrot.slane %v813_v7, %v2883_v38 }
 0x241   : > { %v1032_v17 = vcombine.low %v1008_v8, %v1024_v10  ;;  %v1033_v18 = vcombine.high %v1008_v8, %v1024_v10  ;;  %v1048_v19 = vcombine.low %v1015_v9, %v1031_v11  ;;  %v1049_v20 = vcombine.high %v1015_v9, %v1031_v11  ;;  %v2149_v8 = vld [vmem:[%s470_s29] ss:$0 sm:$0xff]  ;;  %s2133_s29 = sshll.u32 %s2807_s20, 3 }
 0x242   : > { %v828_v21 = vcombine.low %v804_v13, %v820_v15  ;;  %v829_v22 = vcombine.high %v804_v13, %v820_v15  ;;  %v830_v23 = vcombine.low %v811_v14, %v827_v16  ;;  %v831_v24 = vcombine.high %v811_v14, %v827_v16  ;;  %s521_s25 = scalar_lea.vmem [#allocation9], %s2133_s29  ;;  %s2489_s29 = sshll.u32 %s2588_s16, 4  ;;  %s2490_s29 = int_to_ptr.vmem [resolvable:$false] %s2489_s29 }
 0x243   : > { %v1040_v25 = vrot.slane %v1032_v17, %v2883_v38  ;;  %v1047_v26 = vrot.slane %v1033_v18, %v2883_v38  ;;  %v1056_v27 = vrot.slane %v1048_v19, %v2883_v38  ;;  %v1063_v28 = vrot.slane %v1049_v20, %v2883_v38  ;;  %s2025_s12 = sshll.u32 %s521_s25, 4  ;;  %s3093_s12 = int_to_ptr.vmem [resolvable:$true] %s2025_s12 }
 0x244   : > { %v832_v31 = vpack.c.bf16 %v828_v21, %v828_v21  ;;  %v833_v33 = vpack.c.bf16 %v829_v22, %v829_v22  ;;  %v834_v34 = vpack.c.bf16 %v830_v23, %v830_v23  ;;  %v835_v36 = vpack.c.bf16 %v831_v24, %v831_v24  ;;  %s2485_s27 = scalar_lea.vmem %s3093_s12, 128  ;;  %p2492_p13 = scmp.lt.s32.totalorder %s3093_s12, %s2490_s29 }
 0x245   : > { %v1068_v37 = vcombine.low %v1040_v25, %v1047_v26  ;;  %v2147_v39 = vcombine.high %v1040_v25, %v1047_v26  ;;  %v1084_v40 = vcombine.low %v1056_v27, %v1063_v28  ;;  %v2148_v41 = vcombine.high %v1056_v27, %v1063_v28  ;;  %p2486_p6 = scmp.ne.s32.totalorder %s3093_s12, %s2485_s27 }
 0x246   : > { %837 = vst.msk [vmem:[#allocation2] sm:$0xf] %vm836_vm2, %v832_v31  ;;  %838 = vst.msk [vmem:[#allocation2 + $0x4] sm:$0xf] %vm836_vm2, %v833_v33 }
 0x247   : > { %839 = vst.msk [vmem:[#allocation2 + $0x8] sm:$0xf] %vm836_vm2, %v834_v34  ;;  %840 = vst.msk [vmem:[#allocation2 + $0xc] sm:$0xf] %vm836_vm2, %v835_v36  ;;  %v1075_v42 = vrot.slane %v1068_v37, %v2871_v32  ;;  %v1083_v43 = vrot.slane %v2147_v39, %v2871_v32  ;;  %v1091_v44 = vrot.slane %v1084_v40, %v2871_v32  ;;  %p2487_p10 = pnand %p2486_p6, %p2756_p8 }
 0x248   : > { %v1099_v45 = vrot.slane %v2148_v41, %v2871_v32 }
 0x249   : > { %v1100_v46 = vcombine.low %v1075_v42, %v1083_v43  ;;  %v1101_v54 = vcombine.high %v1075_v42, %v1083_v43  ;;  %p2488_p12 = pneg %p2487_p10 }
 0x24a   : > { %v1116_v47 = vcombine.low %v1091_v44, %v1099_v45  ;;  %v1117_v55 = vcombine.high %v1091_v44, %v1099_v45 }
 0x24b   : > { %v1108_v48 = vrot.slane %v1100_v46, %v2883_v38  ;;  %v1115_v62 = vrot.slane %v1101_v54, %v2883_v38 }
 0x24c   : > { %v1124_v49 = vrot.slane %v1116_v47, %v2883_v38  ;;  %v1131_v63 = vrot.slane %v1117_v55, %v2883_v38 }
 0x24d   : > { %v1140_v50 = vld [vmem:[#allocation2] sm:$0xf]  ;;  %v1141_v51 = vld [vmem:[#allocation2 + $0x4] sm:$0xf] }
 0x24e   : > { %v1155_v52 = vsel %vm1150_vm3, %v1140_v50, 0  ;;  %v1201_v53 = vsel %vm1150_vm3, %v1141_v51, 0  ;;  %v1132_v56 = vcombine.low %v1108_v48, %v1124_v49  ;;  %v1133_v57 = vcombine.high %v1108_v48, %v1124_v49  ;;  %v1142_v58 = vld [vmem:[#allocation2 + $0x8] sm:$0xf]  ;;  %v1143_v59 = vld [vmem:[#allocation2 + $0xc] sm:$0xf] }
 0x24f   : > { %2232 = vmatpush3.bf16.xpose.msra.mxu0 %v1155_v52  ;;  %2238 = vmatpush3.bf16.xpose.msra.mxu1 %v1201_v53  ;;  %v1247_v1 = vsel %vm1150_vm3, %v1142_v58, 0  ;;  %v1293_v2 = vsel %vm1150_vm3, %v1143_v59, 0  ;;  %v1134_v3 = vcombine.low %v1115_v62, %v1131_v63  ;;  %v1135_v4 = vcombine.high %v1115_v62, %v1131_v63 }
 0x250   : > { %2243 = vmatprep.subr.bf16.mxu0 %v2577_v0  ;;  %2249 = vmatprep.subr.bf16.mxu1 %v2577_v0  ;;  %v1136_v60 = vpack.c.bf16 %v1132_v56, %v1132_v56  ;;  %v1137_v61 = vpack.c.bf16 %v1133_v57, %v1133_v57 }
 0x251   : > { %v1138_v6 = vpack.c.bf16 %v1134_v3, %v1134_v3  ;;  %v1139_v7 = vpack.c.bf16 %v1135_v4, %v1135_v4 }
 0x256   : > { %2234 = vmatmul.mubr.msk.bf16.vlgmr.msra.gmra.mrb[0].mxu0 %vm1150_vm3, %v1136_v60  ;;  %2240 = vmatmul.mubr.msk.bf16.vlgmr.msra.gmra.mrb[8].mxu1 %vm1150_vm3, %v1137_v61 }
 0x257   : > { %2244 = vmatpush3.bf16.xpose.msra.mxu0 %v1247_v1  ;;  %2250 = vmatpush3.bf16.xpose.msra.mxu1 %v1293_v2 }
 0x258   : > { %2245 = vmatprep.mubr.msk.bf16.mxu0 %vm2578_vm0, %v2577_v0  ;;  %2251 = vmatprep.mubr.msk.bf16.mxu1 %vm2578_vm0, %v2577_v0 }
 0x259   : > { %2255 = vmatprep.subr.bf16.mxu0 %v2577_v0  ;;  %2261 = vmatprep.subr.bf16.mxu1 %v2577_v0 }
 0x25e   : > { %2246 = vmatmul.mubr.msk.bf16.vlgmr.msra.gmra.mrb[4].mxu0 %vm1150_vm3, %v1138_v6  ;;  %2252 = vmatmul.mubr.msk.bf16.vlgmr.msra.gmra.mrb[12].mxu1 %vm1150_vm3, %v1139_v7 }
 0x25f   : > { %2257 = vmatprep.mubr.msk.bf16.mxu0 %vm2578_vm0, %v2577_v0  ;;  %2263 = vmatprep.mubr.msk.bf16.mxu1 %vm2578_vm0, %v2577_v0 }
 0x329   : > { %v1191_v9 = vpop.f32.mrb[0].mxu0  ;;  %v1237_v10 = vpop.f32.mrb[8].mxu1 }
 0x32a   : > { %v1192_v11 = vadd.f32 %v2149_v8, %v1191_v9  ;;  %v1238_v13 = vadd.f32 %v2149_v8, %v1237_v10  ;;  %v2235_v14 = vpop.f32.mrb[1].mxu0  ;;  %v2241_v15 = vpop.f32.mrb[9].mxu1 }
 0x32b   : > { %v1194_v16 = vpop.f32.mrb[2].mxu0  ;;  %v1240_v17 = vpop.f32.mrb[10].mxu1 }
 0x32c   : > { %v2236_v18 = vpop.f32.mrb[3].mxu0  ;;  %v2242_v19 = vpop.f32.mrb[11].mxu1  ;;  %v1335_v20 = vsel %vm1150_vm3, %v1192_v11, -inf  ;;  %v1338_v21 = vsel %vm1150_vm3, %v1238_v13, -inf }
 0x32d   : > { %1336 = vmax.xlane.f32.xlu1 %v1335_v20  ;;  %1339 = vmax.xlane.f32.xlu0 %v1338_v21 }
 0x331   : > { %v1283_v22 = vpop.f32.mrb[4].mxu0  ;;  %v1329_v23 = vpop.f32.mrb[12].mxu1 }
 0x332   : > { %v1284_v24 = vadd.f32 %v2149_v8, %v1283_v22  ;;  %v1330_v25 = vadd.f32 %v2149_v8, %v1329_v23  ;;  %v2247_v26 = vpop.f32.mrb[5].mxu0  ;;  %v2253_v27 = vpop.f32.mrb[13].mxu1 }
 0x333   : > { %v1286_v28 = vpop.f32.mrb[6].mxu0  ;;  %v1332_v31 = vpop.f32.mrb[14].mxu1 }
 0x334   : > { %v2248_v33 = vpop.f32.mrb[7].mxu0  ;;  %v2254_v34 = vpop.f32.mrb[15].mxu1  ;;  %v1341_v36 = vsel %vm1150_vm3, %v1284_v24, -inf  ;;  %v1344_v37 = vsel %vm1150_vm3, %v1330_v25, -inf }
 0x335   : > { %1342 = vmax.xlane.f32.xlu0 %v1341_v36  ;;  %1345 = vmax.xlane.f32.xlu1 %v1344_v37 }
 0x346   : > { %686 = vrot.lane.b32.xlu1 %v2869_v30, %s2579_s21 }
 0x34a   : > { %688 = vrot.lane.b32.xlu1 %v2867_v29, %s2579_s21 }
 0x34b   : > { %684 = vrot.lane.b32.xlu0 %v2862_v12, %s2579_s21 }
 0x34f   : > { %690 = vrot.lane.b32.xlu0 %v2877_v35, %s2579_s21  ;;  %s2011_s21 = scalar_lea.sflag [#allocation6], %s2807_s20 }
 0x3ba   : > { %v1337_v39 = vpop.xlane.xlu1 %1336  ;;  %v1340_v40 = vpop.xlane.xlu0 %1339 }
 0x3bb   : > { %v1347_v41 = vsub.f32 %v1192_v11, %v1337_v39  ;;  %v1348_v42 = vsub.f32 %v1238_v13, %v1340_v40 }
 0x3bd   : > { %v1351_v43 = vmul.f32 1.442695, %v1347_v41  ;;  %v1353_v44 = vmul.f32 1.442695, %v1348_v42 }
 0x3bf   : > { %2405 = vpow2.f32 %v1351_v43 }
 0x3c0   : > { %2407 = vpow2.f32 %v1353_v44 }
 0x3c2   : > { %v1343_v45 = vpop.xlane.xlu0 %1342  ;;  %v1346_v46 = vpop.xlane.xlu1 %1345 }
 0x3c3   : > { %v1349_v30 = vsub.f32 %v1284_v24, %v1343_v45  ;;  %v1350_v47 = vsub.f32 %v1330_v25, %v1346_v46 }
 0x3c5   : > { %v1355_v48 = vmul.f32 1.442695, %v1349_v30  ;;  %v1357_v29 = vmul.f32 1.442695, %v1350_v47 }
 0x3c6   : > { %v685_v49 = vpop.permute.xlu0 %684  ;;  %v687_v50 = vpop.permute.xlu1 %686 }
 0x3c7   : > { %2409 = vpow2.f32 %v1355_v48 }
 0x3c8   : > { %2411 = vpow2.f32 %v1357_v29 }
 0x3c9   : > { %v2955_v12 = vpop.eup %2405 }
 0x3ca   : > { %v2957_v35 = vpop.eup %2407  ;;  %v691_v51 = vpop.permute.xlu0 %690  ;;  %v1359_v53 = vsel %vm1150_vm3, %v2955_v12, 0.0 }
 0x3cb   : > { %v689_v52 = vpop.permute.xlu1 %688  ;;  %v712_v54 = vcombine.low %v687_v50, %v691_v51  ;;  %v713_v55 = vcombine.high %v687_v50, %v691_v51  ;;  %1360 = vadd.xlane.f32.xlu1 %v1359_v53  ;;  %v1362_v58 = vsel %vm1150_vm3, %v2957_v35, 0.0 }
 0x3cc   : > { %v696_v56 = vcombine.low %v685_v49, %v689_v52  ;;  %v697_v57 = vcombine.high %v685_v49, %v689_v52  ;;  %1363 = vadd.xlane.f32.xlu0 %v1362_v58 }
 0x3cd   : > { %v720_v59 = vrot.slane %v712_v54, %v2871_v32  ;;  %v727_v60 = vrot.slane %v713_v55, %v2871_v32 }
 0x3ce   : > { %v704_v61 = vrot.slane %v696_v56, %v2871_v32  ;;  %v711_v62 = vrot.slane %v697_v57, %v2871_v32 }
 0x3d0   : > { %v728_v63 = vcombine.low %v704_v61, %v720_v59  ;;  %v729_v1 = vcombine.high %v704_v61, %v720_v59  ;;  %v744_v2 = vcombine.low %v711_v62, %v727_v60  ;;  %v745_v3 = vcombine.high %v711_v62, %v727_v60 }
 0x3d1   : > { %v2967_v4 = vpop.eup %2409 }
 0x3d2   : > { %v736_v6 = vrot.slane %v728_v63, %v2883_v38  ;;  %v743_v7 = vrot.slane %v729_v1, %v2883_v38  ;;  %v752_v8 = vrot.slane %v744_v2, %v2883_v38  ;;  %v759_v9 = vrot.slane %v745_v3, %v2883_v38  ;;  %v2973_v10 = vpop.eup %2411 }
 0x3d3   : > { %v1365_v11 = vsel %vm1150_vm3, %v2967_v4, 0.0  ;;  %v1368_v17 = vsel %vm1150_vm3, %v2973_v10, 0.0 }
 0x3d4   : > { %v841_v13 = vcombine.low %v736_v6, %v743_v7  ;;  %v2141_v14 = vcombine.high %v736_v6, %v743_v7  ;;  %v857_v15 = vcombine.low %v752_v8, %v759_v9  ;;  %v2142_v16 = vcombine.high %v752_v8, %v759_v9  ;;  %1366 = vadd.xlane.f32.xlu0 %v1365_v11 }
 0x3d5   : > { %1369 = vadd.xlane.f32.xlu1 %v1368_v17 }
 0x3d6   : > { %v848_v18 = vrot.slane %v841_v13, %v2871_v32  ;;  %v856_v19 = vrot.slane %v2141_v14, %v2871_v32  ;;  %v864_v20 = vrot.slane %v857_v15, %v2871_v32  ;;  %v872_v21 = vrot.slane %v2142_v16, %v2871_v32 }
 0x3d8   : > { %v873_v22 = vcombine.low %v848_v18, %v856_v19  ;;  %v874_v23 = vcombine.high %v848_v18, %v856_v19  ;;  %v889_v24 = vcombine.low %v864_v20, %v872_v21  ;;  %v890_v25 = vcombine.high %v864_v20, %v872_v21 }
 0x3da   : > { %v881_v26 = vrot.slane %v873_v22, %v2883_v38  ;;  %v888_v27 = vrot.slane %v874_v23, %v2883_v38  ;;  %v897_v28 = vrot.slane %v889_v24, %v2883_v38  ;;  %v904_v31 = vrot.slane %v890_v25, %v2883_v38 }
 0x3dc   : > { %v905_v33 = vcombine.low %v881_v26, %v897_v28  ;;  %v906_v34 = vcombine.high %v881_v26, %v897_v28  ;;  %v907_v36 = vcombine.low %v888_v27, %v904_v31  ;;  %v908_v37 = vcombine.high %v888_v27, %v904_v31 }
 0x3de   : > { %v909_v39 = vpack.c.bf16 %v905_v33, %v905_v33  ;;  %v910_v40 = vpack.c.bf16 %v906_v34, %v906_v34  ;;  %v911_v41 = vpack.c.bf16 %v907_v36, %v907_v36  ;;  %v912_v42 = vpack.c.bf16 %v908_v37, %v908_v37  ;;  %v2397_v33 = vld [vmem:[%s3145_s4] sm:$0xff]  }
 0x3e0   : > { %913 = vst.msk [vmem:[#allocation3] sm:$0xf] %vm836_vm2, %v909_v39  ;;  %914 = vst.msk [vmem:[#allocation3 + $0x4] sm:$0xf] %vm836_vm2, %v910_v40 }
 0x3e1   : > { %915 = vst.msk [vmem:[#allocation3 + $0x8] sm:$0xf] %vm836_vm2, %v911_v41  ;;  %916 = vst.msk [vmem:[#allocation3 + $0xc] sm:$0xf] %vm836_vm2, %v912_v42 }
 0x3e7   : > { %v1383_v43 = vld [vmem:[#allocation3] sm:$0xf]  ;;  %v1384_v44 = vld [vmem:[#allocation3 + $0x4] sm:$0xf] }
 0x3e8   : > { %v1392_v45 = vsel %vm1390_vm4, %v1383_v43, 0  ;;  %v1438_v46 = vsel %vm1390_vm4, %v1384_v44, 0  ;;  %v1385_v52 = vld [vmem:[#allocation3 + $0x8] sm:$0xf]  ;;  %v1386_v55 = vld [vmem:[#allocation3 + $0xc] sm:$0xf] }
 0x3e9   : > { %2256 = vmatpush3.bf16.msra.mxu0 %v1392_v45  ;;  %2262 = vmatpush3.bf16.msra.mxu1 %v1438_v46  ;;  %v1484_v57 = vsel %vm1390_vm4, %v1385_v52, 0  ;;  %v1530_v58 = vsel %vm1390_vm4, %v1386_v55, 0  ;;  %v2398_v44 = vld [vmem:[%s3145_s4 + $0x8] sm:$0xff]  }
 0x3ea   : > { %2267 = vmatprep.subr.bf16.mxu0 %v2577_v0  ;;  %2273 = vmatprep.subr.bf16.mxu1 %v2577_v0 }
 0x458   : > { %v1361_v30 = vpop.xlane.xlu1 %1360 }
 0x459   : > { %2413 = vrcp.f32 %v1361_v30  ;;  %v1364_v47 = vpop.xlane.xlu0 %1363 }
 0x45a   : > { %2415 = vrcp.f32 %v1364_v47 }
 0x461   : > { %v1367_v48 = vpop.xlane.xlu0 %1366 }
 0x462   : > { %2417 = vrcp.f32 %v1367_v48  ;;  %v1370_v29 = vpop.xlane.xlu1 %1369 }
 0x463   : > { %v2414_v49 = vpop.eup %2413  ;;  %2419 = vrcp.f32 %v1370_v29 }
 0x464   : > { %v1375_v50 = vmul.f32 %v2414_v49, %v2955_v12  ;;  %v2416_v51 = vpop.eup %2415 }
 0x465   : > { %v1376_v53 = vmul.f32 %v2416_v51, %v2957_v35 }
 0x466   : > { %v1379_v54 = vpack.c.bf16 %v1375_v50, %v1375_v50 }
 0x467   : > { %v1380_v56 = vpack.c.bf16 %v1376_v53, %v1376_v53 }
 0x468   : > { %2258 = vmatmul.mubr.msk.bf16.vlgmr.msra.gmra.mrb[8].mxu0 %vm1150_vm3, %v1379_v54 }
 0x469   : > { %2268 = vmatpush3.bf16.msra.mxu0 %v1484_v57  ;;  %2269 = vmatprep.mubr.msk.bf16.mxu0 %vm2578_vm0, %v2577_v0 }
 0x46a   : > { %2264 = vmatmul.mubr.msk.bf16.vlgmr.msra.gmra.mrb[16].mxu1 %vm1150_vm3, %v1380_v56  ;;  %2279 = vmatprep.subr.bf16.mxu0 %v2577_v0 }
 0x46b   : > { %2274 = vmatpush3.bf16.msra.mxu1 %v1530_v58  ;;  %2275 = vmatprep.mubr.msk.bf16.mxu1 %vm2578_vm0, %v2577_v0 }
 0x46c   : > { %v2418_v12 = vpop.eup %2417  ;;  %2287 = vmatprep.subr.bf16.mxu1 %v2577_v0 }
 0x46d   : > { %v1377_v35 = vmul.f32 %v2418_v12, %v2967_v4  ;;  %v2420_v59 = vpop.eup %2419 }
 0x46e   : > { %v1378_v60 = vmul.f32 %v2420_v59, %v2973_v10 }
 0x46f   : > { %v1381_v61 = vpack.c.bf16 %v1377_v35, %v1377_v35 }
 0x470   : > { %v1382_v62 = vpack.c.bf16 %v1378_v60, %v1378_v60 }
 0x471   : > { %2270 = vmatmul.mubr.msk.bf16.vlgmr.msra.gmra.mrb[12].mxu0 %vm1150_vm3, %v1381_v61 }
 0x472   : > { %2283 = vmatprep.mubr.msk.bf16.mxu0 %vm2578_vm0, %v2577_v0  ;;  %2276 = vmatmul.mubr.msk.bf16.vlgmr.msra.gmra.mrb[20].mxu1 %vm1150_vm3, %v1382_v62  ;;  %v2160_v62 = vld [vmem:[%s3146_s5] ss:$0 sm:$0xff] }
 0x473   : > { %2291 = vmatprep.mubr.msk.bf16.mxu1 %vm2578_vm0, %v2577_v0  ;;  %2280 = vmatpush3.bf16.msra.mxu0 %v2397_v33 }
 0x474   : > { %2281 = vmatprep.subr.bf16.mxu0 %v2577_v0 }
 0x477   : > { %2282 = vmatpush3.bf16.msra.mxu0 %v2398_v44 }
 0x478   : > { %2295 = vmatprep.subr.bf16.mxu0 %v2577_v0 }
 0x53b   : > { %v1428_v63 = vpop.f32.mrb[8].mxu0 }
 0x53c   : > { %v2259_v1 = vpop.f32.mrb[9].mxu0 }
 0x53d   : > { %v1474_v2 = vpop.f32.mrb[16].mxu1  ;;  %v1431_v3 = vpop.f32.mrb[10].mxu0 }
 0x53e   : > { %v2265_v4 = vpop.f32.mrb[17].mxu1  ;;  %v2260_v6 = vpop.f32.mrb[11].mxu0 }
 0x53f   : > { %v1477_v7 = vpop.f32.mrb[18].mxu1 }
 0x540   : > { %v2266_v8 = vpop.f32.mrb[19].mxu1 }
 0x544   : > { %v1520_v9 = vpop.f32.mrb[12].mxu0 }
 0x545   : > { %v1572_v10 = vcombine.low %v1428_v63, %v1520_v9  ;;  %v1573_v11 = vcombine.high %v1428_v63, %v1520_v9  ;;  %v2271_v13 = vpop.f32.mrb[13].mxu0  ;;  %v1566_v14 = vpop.f32.mrb[20].mxu1 }
 0x546   : > { %v1523_v15 = vpop.f32.mrb[14].mxu0  ;;  %v1588_v18 = vcombine.low %v1474_v2, %v1566_v14  ;;  %v1589_v19 = vcombine.high %v1474_v2, %v1566_v14  ;;  %v2277_v20 = vpop.f32.mrb[21].mxu1  ;;  %v2399_v14 = vld [vmem:[#allocation7] sm:$0xff]  }
 0x547   : > { %v1580_v16 = vrot.slane %v1572_v10, %v2871_v32  ;;  %v1587_v17 = vrot.slane %v1573_v11, %v2871_v32  ;;  %v2272_v21 = vpop.f32.mrb[15].mxu0  ;;  %v1569_v22 = vpop.f32.mrb[22].mxu1  ;;  %2288 = vmatpush3.bf16.msra.mxu1 %v2399_v14  ;;  %v2400_v15 = vld [vmem:[#allocation7 + $0x8] sm:$0xff]  }
 0x548   : > { %v1596_v23 = vrot.slane %v1588_v18, %v2871_v32  ;;  %v1603_v24 = vrot.slane %v1589_v19, %v2871_v32  ;;  %v2278_v25 = vpop.f32.mrb[23].mxu1  ;;  %2289 = vmatprep.subr.bf16.mxu1 %v2577_v0  ;;  %v2164_v19 = vld [vmem:[%s3147_s6] ss:$0 sm:$0xff] }
 0x549   : > { %v2165_v21 = vld [vmem:[%s3148_s7] ss:$0 sm:$0xff] }
 0x54a   : > { %v1604_v26 = vcombine.low %v1580_v16, %v1596_v23  ;;  %v1605_v27 = vcombine.high %v1580_v16, %v1596_v23  ;;  %v1620_v28 = vcombine.low %v1587_v17, %v1603_v24  ;;  %v1621_v31 = vcombine.high %v1587_v17, %v1603_v24  ;;  %v2401_v25 = vld [vmem:[%s3151_s10] sm:$0xff]  }
 0x54b   : > { %2290 = vmatpush3.bf16.msra.mxu1 %v2400_v15 }
 0x54c   : > { %v1612_v34 = vrot.slane %v1604_v26, %v2883_v38  ;;  %v1619_v36 = vrot.slane %v1605_v27, %v2883_v38  ;;  %v1628_v37 = vrot.slane %v1620_v28, %v2883_v38  ;;  %v1635_v39 = vrot.slane %v1621_v31, %v2883_v38  ;;  %v2402_v26 = vld [vmem:[%s3151_s10 + $0x8] sm:$0xff]   ;;  %v2403_v27 = vld [vmem:[%s3151_s10 + $0x10] sm:$0xff]   ;;  %v2404_v28 = vld [vmem:[%s3151_s10 + $0x18] sm:$0xff]  }
 0x54d   : > { %v2166_v31 = vld [vmem:[%s3150_s9] ss:$0 sm:$0xff] }
 0x54e   : > { %v1640_v40 = vcombine.low %v1612_v34, %v1619_v36  ;;  %v2158_v41 = vcombine.high %v1612_v34, %v1619_v36  ;;  %v1656_v42 = vcombine.low %v1628_v37, %v1635_v39  ;;  %v2159_v43 = vcombine.high %v1628_v37, %v1635_v39 }
 0x550   : > { %v1647_v45 = vrot.slane %v1640_v40, %v2871_v32  ;;  %v1655_v46 = vrot.slane %v2158_v41, %v2871_v32  ;;  %v1663_v30 = vrot.slane %v1656_v42, %v2871_v32  ;;  %v1671_v47 = vrot.slane %v2159_v43, %v2871_v32 }
 0x552   : > { %v1673_v48 = vcombine.high %v1647_v45, %v1655_v46  ;;  %v1689_v29 = vcombine.high %v1663_v30, %v1671_v47  ;;  %v1672_v49 = vcombine.low %v1647_v45, %v1655_v46  ;;  %v1688_v50 = vcombine.low %v1663_v30, %v1671_v47  ;;  %v2170_v45 = vld [vmem:[%s3187_s28] ss:$0 sm:$0xff]  ;;  %s3190_s28 = sld [smem:[#allocation21_spill]] }
 0x554   : > { %v1687_v51 = vrot.slane %v1673_v48, %v2883_v38  ;;  %v1703_v52 = vrot.slane %v1689_v29, %v2883_v38  ;;  %v1680_v53 = vrot.slane %v1672_v49, %v2883_v38  ;;  %v1696_v54 = vrot.slane %v1688_v50, %v2883_v38 }
 0x556   : > { %v1706_v55 = vcombine.low %v1687_v51, %v1703_v52  ;;  %v1705_v56 = vcombine.high %v1680_v53, %v1696_v54  ;;  %v1707_v57 = vcombine.high %v1687_v51, %v1703_v52  ;;  %v1704_v58 = vcombine.low %v1680_v53, %v1696_v54 }
 0x558   : > { %1713 = vrot.lane.b32.xlu1 %v1706_v55, %s2585_s19  ;;  %1709 = vrot.lane.b32.xlu0 %v1705_v56, %s2586_s14  ;;  %s3091_s0 = scalar_lea.hbm %s3190_s28, %s2179_s23 }
 0x55c   : > { %1717 = vrot.lane.b32.xlu1 %v1707_v57, %s2587_s8  ;;  %s3189_s8 = sld [smem:[#allocation20_spill]] }
 0x5ca   : > { %v1714_v32 = vpop.permute.xlu1 %1713  ;;  %v1710_v12 = vpop.permute.xlu0 %1709 }
 0x5cb   : > { %v1720_v35 = vsel %vm1150_vm3, %v1704_v58, %v1710_v12  ;;  %v2176_v12 = vld [vmem:[%s3188_s13] ss:$0 sm:$0xff]  ;;  %s2491_s13 = scalar_lea.vmem %s2490_s29, 256 }
 0x5cc   : > { %v1722_v60 = vsel %vm1721_vm5, %v1720_v35, %v1714_v32  ;;  %p2493_p0 = scmp.lt.s32.totalorder %s2491_s13, %s2485_s27 }
 0x5ce   : > { %v1718_v59 = vpop.permute.xlu1 %1717  ;;  %p2494_p5 = por %p2493_p0, %p2492_p13 }
 0x5cf   : > { %v1724_v61 = vsel %vm1723_vm6, %v1722_v60, %v1718_v59  ;;  %v2177_v59 = vld [vmem:[%s3189_s8] ss:$0 sm:$0xff] }
 0x5d0   : > { %v1725_v38 = vpack.c.bf16 %v1724_v61, %v1724_v61  ;;  %p2495_p9 = pnand %p2494_p5, %p2488_p12 }
 0x5d2   : > { %2284 = vmatmul.mubr.msk.bf16.vlgmr.msra.gmra.mrb[16].mxu0 %vm562_vm1, %v1725_v38 }
 0x5d3   : > { %2303 = vmatprep.mubr.msk.bf16.mxu0 %vm2578_vm0, %v2577_v0  ;;  %2296 = vmatpush3.bf16.msra.mxu0 %v2401_v25 }
 0x5d4   : > { %2297 = vmatprep.subr.bf16.mxu0 %v2577_v0 }
 0x5d7   : > { %2298 = vmatpush3.bf16.msra.mxu0 %v2402_v26 }
 0x5d8   : > { %2299 = vmatprep.subr.bf16.mxu0 %v2577_v0 }
 0x5db   : > { %2300 = vmatpush3.bf16.msra.mxu0 %v2403_v27 }
 0x5dc   : > { %2301 = vmatprep.subr.bf16.mxu0 %v2577_v0 }
 0x5df   : > { %2302 = vmatpush3.bf16.msra.mxu0 %v2404_v28 }
 0x6a5   : > { %v1786_v63 = vpop.f32.mrb[16].mxu0 }
 0x6a6   : > { %v1787_v1 = vadd.f32 %v2160_v62, %v1786_v63  ;;  %v2285_v2 = vpop.f32.mrb[17].mxu0 }
 0x6a7   : > { %v1789_v3 = vpop.f32.mrb[18].mxu0 }
 0x6a8   : > { %v2286_v4 = vpop.f32.mrb[19].mxu0  ;;  %v1792_v6 = vadd.f32 %v1787_v1, %v2842_v5 }
 0x6aa   : > { %v1795_v7 = vsel %vm562_vm1, %v1792_v6, 0.0 }
 0x6ab   : > { %1796 = vadd.xlane.f32.xlu0 %v1795_v7 }
 0x738   : > { %v1797_v8 = vpop.xlane.xlu0 %1796 }
 0x739   : > { %v1799_v9 = vmul.f32 0.03125, %v1797_v8 }
 0x73b   : > { %v1800_v10 = vsub.f32 %v1792_v6, %v1799_v9 }
 0x73d   : > { %v1801_v11 = vmul.f32 %v1800_v10, %v1800_v10 }
 0x73f   : > { %v1802_v13 = vsel %vm562_vm1, %v1801_v11, 0.0 }
 0x740   : > { %1803 = vadd.xlane.f32.xlu1 %v1802_v13 }
 0x7cd   : > { %v1804_v16 = vpop.xlane.xlu1 %1803 }
 0x7ce   : > { %v1805_v17 = vmul.f32 0.03125, %v1804_v16 }
 0x7d0   : > { %v1806_v18 = vadd.f32 1e-12, %v1805_v17 }
 0x7d2   : > { %2421 = vrsqrt.f32 %v1806_v18 }
 0x7dc   : > { %v2422_v5 = vpop.eup %2421 }
 0x7dd   : > { %v1808_v20 = vmul.f32 %v2422_v5, %v1800_v10 }
 0x7df   : > { %v1815_v22 = vmul.f32 %v2164_v19, %v1808_v20 }
 0x7e1   : > { %v1822_v23 = vadd.f32 %v2165_v21, %v1815_v22 }
 0x7e3   : > { %v1823_v24 = vpack.c.bf16 %v1822_v23, %v1822_v23 }
 0x7e5   : > { %2292 = vmatmul.mubr.msk.bf16.vlgmr.msra.gmra.mrb[24].mxu1 %vm562_vm1, %v1823_v24 }
 0x8b8   : > { %v1884_v33 = vpop.f32.mrb[24].mxu1 }
 0x8b9   : > { %v1885_v34 = vadd.f32 %v2166_v31, %v1884_v33  ;;  %v2293_v36 = vpop.f32.mrb[25].mxu1 }
 0x8ba   : > { %v1887_v37 = vpop.f32.mrb[26].mxu1 }
 0x8bb   : > { %v1891_v39 = vmul.f32 0.70710677, %v1885_v34  ;;  %v2294_v40 = vpop.f32.mrb[27].mxu1  ;;  %v1890_v42 = vmul.f32 0.5, %v1885_v34 }
 0x8bd   : > { %2423 = verf.f32 %v1891_v39 }
 0x8c7   : > { %v2424_v41 = vpop.eup %2423 }
 0x8c8   : > { %v1893_v43 = vadd.f32 1.0, %v2424_v41 }
 0x8ca   : > { %v1894_v0 = vmul.f32 %v1893_v43, %v1890_v42 }
 0x8cc   : > { %v1895_v44 = vpack.c.bf16 %v1894_v0, %v1894_v0 }
 0x8ce   : > { %2304 = vmatmul.mubr.msk.bf16.vlgmr.msra.gmra.mrb[20].mxu0 %vm1935_vm7, %v1895_v44 }
 0x9a1   : > { %v1973_v46 = vpop.f32.mrb[20].mxu0 }
 0x9a2   : > { %v1974_v30 = vadd.f32 %v2170_v45, %v1973_v46  ;;  %v2305_v47 = vpop.f32.mrb[21].mxu0 }
 0x9a3   : > { %v1976_v48 = vpop.f32.mrb[22].mxu0 }
 0x9a4   : > { %v2306_v29 = vpop.f32.mrb[23].mxu0  ;;  %v1979_v49 = vadd.f32 %v1974_v30, %v1822_v23 }
 0x9a6   : > { %v1982_v50 = vsel %vm562_vm1, %v1979_v49, 0.0 }
 0x9a7   : > { %1983 = vadd.xlane.f32.xlu0 %v1982_v50 }
 0xa34   : > { %v1984_v51 = vpop.xlane.xlu0 %1983 }
 0xa35   : > { %v1985_v52 = vmul.f32 0.03125, %v1984_v51 }
 0xa37   : > { %v1986_v53 = vsub.f32 %v1979_v49, %v1985_v52 }
 0xa39   : > { %v1987_v54 = vmul.f32 %v1986_v53, %v1986_v53 }
 0xa3b   : > { %v1988_v55 = vsel %vm562_vm1, %v1987_v54, 0.0 }
 0xa3c   : > { %1989 = vadd.xlane.f32.xlu0 %v1988_v55 }
 0xac9   : > { %v1990_v56 = vpop.xlane.xlu0 %1989 }
 0xaca   : > { %v1991_v57 = vmul.f32 0.03125, %v1990_v56 }
 0xacc   : > { %v1992_v58 = vadd.f32 1e-12, %v1991_v57 }
 0xace   : > { %2425 = vrsqrt.f32 %v1992_v58 }
 0xad8   : > { %v2426_v32 = vpop.eup %2425 }
 0xad9   : > { %v1994_v35 = vmul.f32 %v2426_v32, %v1986_v53 }
 0xadb   : > { %v2001_v60 = vmul.f32 %v2176_v12, %v1994_v35 }
 0xadd   : > { %v2008_v61 = vadd.f32 %v2177_v59, %v2001_v60 }
 0xadf   : > { %2009 = vst.msk [vmem:[%s521_s25] sm:$0xff] %vm562_vm1, %v2008_v61 }
 0xae0   : > { %2498 = shalt.err (!%p2495_p9)
}
 0xae1   : > { %s2499_s20 = scalar_lea.hbm %s3091_s0, 128  ;;  %s2503_s8 = scalar_lea.hbm %s3190_s28, 256 }
 0xae2   : > { %p2500_p1 = scmp.ne.s32.totalorder %s3091_s0, %s2499_s20  ;;  %p2504_p3 = scmp.lt.u32.totalorder %s3091_s0, %s3190_s28 }
 0xae3   : > { %p2505_p4 = scmp.lt.u32.totalorder %s2503_s8, %s2499_s20  ;;  %p2507_p6 = scmp.lt.u32.totalorder %s2499_s20, %s3091_s0 }
 0xae4   : > { %p2501_p2 = pnand %p2500_p1, %p2756_p8 }
 0xae5   : > { %p2506_p11 = por %p2505_p4, %p2504_p3 }
 0xae6   : > { %p2502_p7 = pneg %p2501_p2 }
 0xae7   : > { %p2508_p10 = por %p2507_p6, %p2506_p11 }
 0xae9   : > { %p2509_p12 = pnand %p2508_p10, %p2502_p7 }
 0xaeb   : > { %2512 = shalt.err (!%p2509_p12)
}
 0xaec   : > { %2313 = dma.vmem_to_hbm [thread:$0]  (%p2756_p8), %s3093_s12, 128, %s3091_s0, %s2011_s21  }
 0xaed PF: > { %s3191_s22 = sld [smem:[#allocation13_spill]]  ;;  %s3192_s11 = sld [smem:[#allocation14_spill]] }
 0xaee   : > { %p3194_p0 = scmp.ge.s32.totalorder %s2571_s18, 2 }
 0xaf3   : > { %s2037_s27 = sand.u32 1, %s3191_s22   ;;  %p3193_p13 = scmp.ne.s32.totalorder %s3192_s11, 0 }
 0xaf4   : > { %s2038_s16 = scalar_lea.sflag [#allocation6], %s2037_s27 }
 0xaf5   : > { %p2324_p5 = pnand %p3194_p0, %p3193_p13 }
 0xaf7   : > { %2546 = dma.done.wait (!%p2324_p5), %s2038_s16, 128  }
 0xaf8   : > { %2548 = vsyncadd (!%p2324_p5), %s2038_s16, 4294967168  ;;  %s31_s18 = sadd.s32 1, %s2571_s18   ;;  %s3195_s24 = sld [smem:[#allocation15_spill]] }
 0xaf9   : > { %p28_p9 = scmp.ge.s32.totalorder %s31_s18, 4   ;;  %s3196_s29 = smov %s2555_s30 }
 0xafa   : > { %s3197_s30 = smov %s2559_s15  ;;  %s3198_s15 = smov %s2765_s26 }
 0xafb   : > { %s3199_s16 = smov %s2567_s17  ;;  %30 = sbr.rel (!%p28_p9) target bundleno = 14 (0xe), region = 133 }
 0xafe   : > { %s3200_s17 = smov %s3195_s24 }
 0xb02   :  { %2043 = vsyncpa [#allocation5], 1 }
 0xb03   :  { %2045 = vsyncpa [#allocation5 + $0x1], 1 }
 0xb04   :  { %2046 = vsyncpa [#allocation8], 1 }
 0xb05   :  { %2047 = vsyncpa [#allocation6], 1 }
 0xb06   :  { %2049 = vsyncpa [#allocation6 + $0x1], 1 }

</bundles_post_ra>
